<compile_context>
chip_gen: v6e
topology: v6e:2x2x1
jax: 0.10.0
libtpu: 0.0.40
codegen_flags: <defaults>
</compile_context>

<pallas_src>
import math
from functools import partial

import jax
import jax.numpy as jnp
from jax import lax
from jax.experimental import pallas as pl
from jax.experimental.pallas import tpu as pltpu

LN_EPS = 1e-5


# ----------------------------------------------------------------------------
# Pallas kernel: whole forward pass in one invocation.
# ----------------------------------------------------------------------------
def _tcn_chattn_kernel(*refs, config):
    n_in = config["n_in"]
    B = config["batch"]
    T = config["seq_len"]
    K = config["kernel_size"]
    blocks = config["blocks"]          # tuple of (cin, cout) per TemporalBlock
    BT = B * T

    in_refs = refs[:n_in]
    out_ref = refs[n_in]
    it = iter(in_refs)

    x_ref = next(it)
    tpos_ref = next(it)
    tpos = tpos_ref[...]               # (BT, 1) int32: time index of each row

    h = x_ref[...].astype(jnp.float32)  # (BT, C_in) activations, channels on lanes

    def shift_rows(a, s):
        # a[(b, t)] -> a[(b, t - s)], zeros where t < s (causal left pad).
        if s == 0:
            return a
        z = jnp.zeros((s, a.shape[1]), jnp.float32)
        shifted = jnp.concatenate([z, a[:BT - s, :]], axis=0)
        return jnp.where(tpos >= s, shifted, 0.0)

    def causal_conv(a, w_ref, b_ref, dilation):
        # w_ref: (K, Cin, Cout) pre-transposed taps; b_ref: (1, Cout)
        acc = None
        for j in range(K):             # K is tiny and static: unrolled
            s = dilation * (K - 1 - j)
            term = jnp.dot(shift_rows(a, s), w_ref[j],
                           preferred_element_type=jnp.float32)
            acc = term if acc is None else acc + term
        return acc + b_ref[0]

    # ---- TemporalConvNet (dropout = identity in eval mode) ----
    for i, (cin, cout) in enumerate(blocks):
        d = 2 ** i
        w1 = next(it); b1 = next(it)
        w2 = next(it); b2 = next(it)
        if cin != cout:
            wd = next(it); bd = next(it)
            res = jnp.dot(h, wd[...], preferred_element_type=jnp.float32) + bd[0]
        else:
            res = h
        o = jnp.maximum(causal_conv(h, w1, b1, d), 0.0)
        o = jnp.maximum(causal_conv(o, w2, b2, d), 0.0)
        h = jnp.maximum(o + res, 0.0)  # (BT, cout)

    # ---- channel attention: avg/max pool over time + shared SE MLP ----
    inv_t = 1.0 / T
    avg_rows = []
    max_rows = []
    for b in range(B):                 # B tiny & static: unrolled static slices
        seg = h[b * T:(b + 1) * T, :]  # (T, C_last)
        avg_rows.append(jnp.sum(seg, axis=0, keepdims=True) * inv_t)
        max_rows.append(jnp.max(seg, axis=0, keepdims=True))
    avg_p = jnp.concatenate(avg_rows, axis=0)   # (B, C_last)
    max_p = jnp.concatenate(max_rows, axis=0)   # (B, C_last)

    wse1 = next(it); wse2 = next(it)

    def fc_se(p):
        hdn = jnp.maximum(
            jnp.dot(p, wse1[...], preferred_element_type=jnp.float32), 0.0)
        return jnp.dot(hdn, wse2[...], preferred_element_type=jnp.float32)

    z = fc_se(avg_p) + fc_se(max_p)
    ca = 1.0 / (1.0 + jnp.exp(-z))              # sigmoid, (B, C_last)

    # mean_t(h * ca) == ca * mean_t(h) because ca is constant over time,
    # so reuse the already-computed avg pool instead of re-reducing (B,T,C).
    pooled = ca * avg_p                         # (B, C_last)

    # ---- LayerNorm (dropout = identity) ----
    g = next(it); be = next(it)
    mu = jnp.mean(pooled, axis=-1, keepdims=True)
    var = jnp.mean((pooled - mu) * (pooled - mu), axis=-1, keepdims=True)
    y = (pooled - mu) * lax.rsqrt(var + LN_EPS) * g[0] + be[0]

    # ---- classifier head: relu(fc1) -> fc2 (class dim padded to 128 lanes) ----
    wfc1 = next(it); bfc1 = next(it)
    wfc2 = next(it); bfc2 = next(it)
    y = jnp.maximum(
        jnp.dot(y, wfc1[...], preferred_element_type=jnp.float32) + bfc1[0], 0.0)
    logits = jnp.dot(y, wfc2[...], preferred_element_type=jnp.float32) + bfc2[0]

    out_ref[...] = logits.astype(out_ref.dtype)


# ----------------------------------------------------------------------------
# Wrapper: host-side weight prep (transposes / padding) + pallas_call.
# ----------------------------------------------------------------------------
def tcn_with_channel_attention(x, params, *, num_channels, kernel_size,
                               num_classes):
    B, T, c_in = x.shape
    BT = B * T
    c_last = num_channels[-1]
    nc_pad = 128 * pl.cdiv(num_classes, 128)    # lane-dense output store

    x2 = x.reshape(BT, c_in)
    tpos = (jnp.arange(BT, dtype=jnp.int32) % T).reshape(BT, 1)

    flat = [x2, tpos]
    blocks_cfg = []
    cin = c_in
    for i, cout in enumerate(num_channels):
        blk = params["blocks"][i]
        flat.append(jnp.transpose(blk["w1"], (2, 1, 0)))     # (K, cin, cout)
        flat.append(blk["b1"][None, :])
        flat.append(jnp.transpose(blk["w2"], (2, 1, 0)))     # (K, cout, cout)
        flat.append(blk["b2"][None, :])
        if cin != cout:
            flat.append(jnp.transpose(blk["wd"][:, :, 0]))   # (cin, cout)
            flat.append(blk["bd"][None, :])
        blocks_cfg.append((cin, cout))
        cin = cout

    flat.append(params["wse1"].T)                            # (C, C//r)
    flat.append(params["wse2"].T)                            # (C//r, C)
    flat.append(params["ln_g"][None, :])
    flat.append(params["ln_b"][None, :])
    flat.append(params["wfc1"].T)                            # (C, C)
    flat.append(params["bfc1"][None, :])
    wfc2_pad = jnp.zeros((nc_pad, c_last), jnp.float32).at[:num_classes].set(
        params["wfc2"])
    bfc2_pad = jnp.zeros((nc_pad,), jnp.float32).at[:num_classes].set(
        params["bfc2"])
    flat.append(wfc2_pad.T)                                  # (C, nc_pad)
    flat.append(bfc2_pad[None, :])

    config = dict(n_in=len(flat), batch=B, seq_len=T,
                  kernel_size=kernel_size, blocks=tuple(blocks_cfg))

    def full_spec(a):
        nd = a.ndim
        return pl.BlockSpec(a.shape, lambda i, nd=nd: (0,) * nd)

    out_pad = pl.pallas_call(
        partial(_tcn_chattn_kernel, config=config),
        out_shape=jax.ShapeDtypeStruct((B, nc_pad), jnp.float32),
        grid=(1,),                               # whole problem in one step
        in_specs=[full_spec(a) for a in flat],
        out_specs=pl.BlockSpec((B, nc_pad), lambda i: (0, 0)),
        compiler_params=pltpu.CompilerParams(
            dimension_semantics=("arbitrary",)),
    )(*flat)

    return out_pad[:, :num_classes]


# ----------------------------------------------------------------------------
# Pure-JAX reference mirroring the PyTorch module (eval mode).
# ----------------------------------------------------------------------------
def _reference(x, params, *, num_channels, kernel_size):
    a = jnp.transpose(x, (0, 2, 1)).astype(jnp.float32)   # (B, C, T)

    def causal_conv(v, w, b, dilation):
        pad = dilation * (w.shape[-1] - 1)
        v_p = jnp.pad(v, ((0, 0), (0, 0), (pad, 0)))
        out = lax.conv_general_dilated(
            v_p, w, window_strides=(1,), padding="VALID",
            rhs_dilation=(dilation,),
            dimension_numbers=("NCH", "OIH", "NCH"))
        return out + b[None, :, None]

    cin = a.shape[1]
    for i, cout in enumerate(num_channels):
        blk = params["blocks"][i]
        d = 2 ** i
        o = jnp.maximum(causal_conv(a, blk["w1"], blk["b1"], d), 0.0)
        o = jnp.maximum(causal_conv(o, blk["w2"], blk["b2"], d), 0.0)
        res = a if cin == cout else causal_conv(a, blk["wd"], blk["bd"], 1)
        a = jnp.maximum(o + res, 0.0)
        cin = cout

    avg = jnp.mean(a, axis=-1)                    # (B, C)
    mx = jnp.max(a, axis=-1)

    def fc_se(p):
        h = jnp.maximum(p @ params["wse1"].T, 0.0)
        return h @ params["wse2"].T

    ca = jax.nn.sigmoid(fc_se(avg) + fc_se(mx))   # (B, C)
    out = a * ca[:, :, None]
    out = jnp.mean(out, axis=-1)                  # (B, C)

    mu = jnp.mean(out, -1, keepdims=True)
    var = jnp.mean((out - mu) ** 2, -1, keepdims=True)
    out = (out - mu) / jnp.sqrt(var + LN_EPS) * params["ln_g"] + params["ln_b"]

    out = jnp.maximum(out @ params["wfc1"].T + params["bfc1"], 0.0)
    return out @ params["wfc2"].T + params["bfc2"]


# ----------------------------------------------------------------------------
# Parameter initialization (PyTorch-shaped weights; weight_norm folded).
# ----------------------------------------------------------------------------
def init_params(key, *, input_dim, num_channels, kernel_size, num_classes,
                reduction_ratio):
    keys = iter(jax.random.split(key, 32))

    def nrm(shape):
        return 0.01 * jax.random.normal(next(keys), shape, jnp.float32)

    def uni(shape, fan_in):
        lim = 1.0 / math.sqrt(fan_in)
        return jax.random.uniform(next(keys), shape, jnp.float32, -lim, lim)

    blocks = []
    cin = input_dim
    for cout in num_channels:
        blk = {
            "w1": nrm((cout, cin, kernel_size)),
            "b1": uni((cout,), cin * kernel_size),
            "w2": nrm((cout, cout, kernel_size)),
            "b2": uni((cout,), cout * kernel_size),
        }
        if cin != cout:
            blk["wd"] = nrm((cout, cin, 1))
            blk["bd"] = uni((cout,), cin)
        blocks.append(blk)
        cin = cout

    C = num_channels[-1]
    Cr = C // reduction_ratio
    return {
        "blocks": blocks,
        "wse1": uni((Cr, C), C),       # fc_se[0], bias=False
        "wse2": uni((C, Cr), Cr),      # fc_se[2], bias=False
        "ln_g": jnp.ones((C,), jnp.float32)
                + 0.1 * jax.random.normal(next(keys), (C,), jnp.float32),
        "ln_b": 0.1 * jax.random.normal(next(keys), (C,), jnp.float32),
        "wfc1": uni((C, C), C),
        "bfc1": uni((C,), C),
        "wfc2": uni((num_classes, C), C),
        "bfc2": uni((num_classes,), C),
    }


if __name__ == "__main__":
    B, T = 2, 16
    INPUT_DIM = 32
    NUM_CHANNELS = [64, 128]
    KERNEL_SIZE = 3
    NUM_CLASSES = 8
    REDUCTION = 16

    root = jax.random.PRNGKey(0)
    kx, kp = jax.random.split(root)
    x = jax.random.normal(kx, (B, T, INPUT_DIM), jnp.float32)
    params = init_params(kp, input_dim=INPUT_DIM, num_channels=NUM_CHANNELS,
                         kernel_size=KERNEL_SIZE, num_classes=NUM_CLASSES,
                         reduction_ratio=REDUCTION)

    out = tcn_with_channel_attention(
        x, params, num_channels=NUM_CHANNELS, kernel_size=KERNEL_SIZE,
        num_classes=NUM_CLASSES)
    out = jax.block_until_ready(out)

    ref = _reference(x, params, num_channels=NUM_CHANNELS,
                     kernel_size=KERNEL_SIZE)

    assert out.shape == (B, NUM_CLASSES)
    err = jnp.max(jnp.abs(out - ref))
    assert jnp.allclose(out, ref, atol=1e-4, rtol=1e-4), f"max abs err {err}"
    print("KERNEL_OK")
</pallas_src>

<mosaic_0001>
module attributes {stable_mosaic.version = 11 : i64} {
  func.func @_tcn_chattn_kernel(%arg0: i32, %arg1: memref<32x32xf32, #tpu.memory_space<vmem>>, %arg2: memref<32x1xi32, #tpu.memory_space<vmem>>, %arg3: memref<3x32x64xf32, #tpu.memory_space<vmem>>, %arg4: memref<1x64xf32, #tpu.memory_space<vmem>>, %arg5: memref<3x64x64xf32, #tpu.memory_space<vmem>>, %arg6: memref<1x64xf32, #tpu.memory_space<vmem>>, %arg7: memref<32x64xf32, #tpu.memory_space<vmem>>, %arg8: memref<1x64xf32, #tpu.memory_space<vmem>>, %arg9: memref<3x64x128xf32, #tpu.memory_space<vmem>>, %arg10: memref<1x128xf32, #tpu.memory_space<vmem>>, %arg11: memref<3x128x128xf32, #tpu.memory_space<vmem>>, %arg12: memref<1x128xf32, #tpu.memory_space<vmem>>, %arg13: memref<64x128xf32, #tpu.memory_space<vmem>>, %arg14: memref<1x128xf32, #tpu.memory_space<vmem>>, %arg15: memref<128x8xf32, #tpu.memory_space<vmem>>, %arg16: memref<8x128xf32, #tpu.memory_space<vmem>>, %arg17: memref<1x128xf32, #tpu.memory_space<vmem>>, %arg18: memref<1x128xf32, #tpu.memory_space<vmem>>, %arg19: memref<128x128xf32, #tpu.memory_space<vmem>>, %arg20: memref<1x128xf32, #tpu.memory_space<vmem>>, %arg21: memref<128x128xf32, #tpu.memory_space<vmem>>, %arg22: memref<1x128xf32, #tpu.memory_space<vmem>>, %arg23: memref<2x128xf32, #tpu.memory_space<vmem>>) attributes {dimension_semantics = [#tpu.dimension_semantics<arbitrary>], iteration_bounds = array<i64: 1>, scalar_prefetch = 0 : i64, scratch_operands = 0 : i64, tpu.core_type = #tpu.core_type<tc>, window_params = [{pipeline_mode = #tpu.pipeline_mode<synchronous>, transform_indices = @transform_0, window_bounds = array<i64: 32, 32>}, {pipeline_mode = #tpu.pipeline_mode<synchronous>, transform_indices = @transform_1, window_bounds = array<i64: 32, 1>}, {pipeline_mode = #tpu.pipeline_mode<synchronous>, transform_indices = @transform_2, window_bounds = array<i64: 3, 32, 64>}, {pipeline_mode = #tpu.pipeline_mode<synchronous>, transform_indices = @transform_3, window_bounds = array<i64: 1, 64>}, {pipeline_mode = #tpu.pipeline_mode<synchronous>, transform_indices = @transform_4, window_bounds = array<i64: 3, 64, 64>}, {pipeline_mode = #tpu.pipeline_mode<synchronous>, transform_indices = @transform_5, window_bounds = array<i64: 1, 64>}, {pipeline_mode = #tpu.pipeline_mode<synchronous>, transform_indices = @transform_6, window_bounds = array<i64: 32, 64>}, {pipeline_mode = #tpu.pipeline_mode<synchronous>, transform_indices = @transform_7, window_bounds = array<i64: 1, 64>}, {pipeline_mode = #tpu.pipeline_mode<synchronous>, transform_indices = @transform_8, window_bounds = array<i64: 3, 64, 128>}, {pipeline_mode = #tpu.pipeline_mode<synchronous>, transform_indices = @transform_9, window_bounds = array<i64: 1, 128>}, {pipeline_mode = #tpu.pipeline_mode<synchronous>, transform_indices = @transform_10, window_bounds = array<i64: 3, 128, 128>}, {pipeline_mode = #tpu.pipeline_mode<synchronous>, transform_indices = @transform_11, window_bounds = array<i64: 1, 128>}, {pipeline_mode = #tpu.pipeline_mode<synchronous>, transform_indices = @transform_12, window_bounds = array<i64: 64, 128>}, {pipeline_mode = #tpu.pipeline_mode<synchronous>, transform_indices = @transform_13, window_bounds = array<i64: 1, 128>}, {pipeline_mode = #tpu.pipeline_mode<synchronous>, transform_indices = @transform_14, window_bounds = array<i64: 128, 8>}, {pipeline_mode = #tpu.pipeline_mode<synchronous>, transform_indices = @transform_15, window_bounds = array<i64: 8, 128>}, {pipeline_mode = #tpu.pipeline_mode<synchronous>, transform_indices = @transform_16, window_bounds = array<i64: 1, 128>}, {pipeline_mode = #tpu.pipeline_mode<synchronous>, transform_indices = @transform_17, window_bounds = array<i64: 1, 128>}, {pipeline_mode = #tpu.pipeline_mode<synchronous>, transform_indices = @transform_18, window_bounds = array<i64: 128, 128>}, {pipeline_mode = #tpu.pipeline_mode<synchronous>, transform_indices = @transform_19, window_bounds = array<i64: 1, 128>}, {pipeline_mode = #tpu.pipeline_mode<synchronous>, transform_indices = @transform_20, window_bounds = array<i64: 128, 128>}, {pipeline_mode = #tpu.pipeline_mode<synchronous>, transform_indices = @transform_21, window_bounds = array<i64: 1, 128>}, {pipeline_mode = #tpu.pipeline_mode<synchronous>, transform_indices = @transform_22, window_bounds = array<i64: 2, 128>}]} {
    %c0 = arith.constant 0 : index
    %c0_0 = arith.constant 0 : index
    %0 = vector.load %arg2[%c0, %c0_0] : memref<32x1xi32, #tpu.memory_space<vmem>>, vector<32x1xi32>
    %c0_1 = arith.constant 0 : index
    %c0_2 = arith.constant 0 : index
    %1 = vector.load %arg1[%c0_1, %c0_2] : memref<32x32xf32, #tpu.memory_space<vmem>>, vector<32x32xf32>
    %c0_3 = arith.constant 0 : index
    %c0_4 = arith.constant 0 : index
    %2 = vector.load %arg7[%c0_3, %c0_4] : memref<32x64xf32, #tpu.memory_space<vmem>>, vector<32x64xf32>
    %cst = arith.constant dense<0.000000e+00> : vector<32x64xf32>
    %3 = tpu.matmul %1, %2, %cst {dimension_numbers = #tpu.dot_dimension_numbers<[1], [0], [0], [1], [0, 0, 1, 1], [], []>} : vector<32x32xf32>, vector<32x64xf32>, vector<32x64xf32> -> vector<32x64xf32>
    %c0_5 = arith.constant 0 : index
    %c0_6 = arith.constant 0 : index
    %4 = vector.load %arg8[%c0_5, %c0_6] : memref<1x64xf32, #tpu.memory_space<vmem>>, vector<1x64xf32>
    %5 = vector.shape_cast %4 : vector<1x64xf32> to vector<64xf32>
    %6 = vector.shape_cast %5 : vector<64xf32> to vector<1x64xf32>
    %7 = vector.broadcast %6 : vector<1x64xf32> to vector<32x64xf32>
    %8 = arith.addf %3, %7 : vector<32x64xf32>
    %cst_7 = arith.constant 0.000000e+00 : f32
    %9 = vector.broadcast %cst_7 : f32 to vector<2x32xf32>
    %10 = vector.extract_strided_slice %1 {offsets = [0, 0], sizes = [30, 32], strides = [1, 1]} : vector<32x32xf32> to vector<30x32xf32>
    %11 = tpu.concatenate %9, %10 in 0 : vector<2x32xf32>, vector<30x32xf32> -> vector<32x32xf32>
    %c2_i32 = arith.constant 2 : i32
    %12 = vector.broadcast %c2_i32 : i32 to vector<32x1xi32>
    %13 = arith.cmpi sge, %0, %12 : vector<32x1xi32>
    %cst_8 = arith.constant 0.000000e+00 : f32
    %14 = vector.shape_cast %13 : vector<32x1xi1> to vector<32x1xi1>
    %15 = vector.broadcast %14 : vector<32x1xi1> to vector<32x32xi1>
    %16 = vector.broadcast %cst_8 : f32 to vector<32x32xf32>
    %17 = arith.select %15, %11, %16 : vector<32x32xi1>, vector<32x32xf32>
    %c0_9 = arith.constant 0 : index
    %c0_10 = arith.constant 0 : index
    %c0_11 = arith.constant 0 : index
    %18 = vector.load %arg3[%c0_9, %c0_10, %c0_11] : memref<3x32x64xf32, #tpu.memory_space<vmem>>, vector<1x32x64xf32>
    %19 = vector.shape_cast %18 : vector<1x32x64xf32> to vector<32x64xf32>
    %cst_12 = arith.constant dense<0.000000e+00> : vector<32x64xf32>
    %20 = tpu.matmul %17, %19, %cst_12 {dimension_numbers = #tpu.dot_dimension_numbers<[1], [0], [0], [1], [0, 0, 1, 1], [], []>} : vector<32x32xf32>, vector<32x64xf32>, vector<32x64xf32> -> vector<32x64xf32>
    %cst_13 = arith.constant 0.000000e+00 : f32
    %21 = vector.broadcast %cst_13 : f32 to vector<1x32xf32>
    %22 = vector.extract_strided_slice %1 {offsets = [0, 0], sizes = [31, 32], strides = [1, 1]} : vector<32x32xf32> to vector<31x32xf32>
    %23 = tpu.concatenate %21, %22 in 0 : vector<1x32xf32>, vector<31x32xf32> -> vector<32x32xf32>
    %c1_i32 = arith.constant 1 : i32
    %24 = vector.broadcast %c1_i32 : i32 to vector<32x1xi32>
    %25 = arith.cmpi sge, %0, %24 : vector<32x1xi32>
    %cst_14 = arith.constant 0.000000e+00 : f32
    %26 = vector.shape_cast %25 : vector<32x1xi1> to vector<32x1xi1>
    %27 = vector.broadcast %26 : vector<32x1xi1> to vector<32x32xi1>
    %28 = vector.broadcast %cst_14 : f32 to vector<32x32xf32>
    %29 = arith.select %27, %23, %28 : vector<32x32xi1>, vector<32x32xf32>
    %c1 = arith.constant 1 : index
    %c0_15 = arith.constant 0 : index
    %c0_16 = arith.constant 0 : index
    %30 = vector.load %arg3[%c1, %c0_15, %c0_16] : memref<3x32x64xf32, #tpu.memory_space<vmem>>, vector<1x32x64xf32>
    %31 = vector.shape_cast %30 : vector<1x32x64xf32> to vector<32x64xf32>
    %cst_17 = arith.constant dense<0.000000e+00> : vector<32x64xf32>
    %32 = tpu.matmul %29, %31, %cst_17 {dimension_numbers = #tpu.dot_dimension_numbers<[1], [0], [0], [1], [0, 0, 1, 1], [], []>} : vector<32x32xf32>, vector<32x64xf32>, vector<32x64xf32> -> vector<32x64xf32>
    %33 = arith.addf %20, %32 : vector<32x64xf32>
    %c2 = arith.constant 2 : index
    %c0_18 = arith.constant 0 : index
    %c0_19 = arith.constant 0 : index
    %34 = vector.load %arg3[%c2, %c0_18, %c0_19] : memref<3x32x64xf32, #tpu.memory_space<vmem>>, vector<1x32x64xf32>
    %35 = vector.shape_cast %34 : vector<1x32x64xf32> to vector<32x64xf32>
    %cst_20 = arith.constant dense<0.000000e+00> : vector<32x64xf32>
    %36 = tpu.matmul %1, %35, %cst_20 {dimension_numbers = #tpu.dot_dimension_numbers<[1], [0], [0], [1], [0, 0, 1, 1], [], []>} : vector<32x32xf32>, vector<32x64xf32>, vector<32x64xf32> -> vector<32x64xf32>
    %37 = arith.addf %33, %36 : vector<32x64xf32>
    %c0_21 = arith.constant 0 : index
    %c0_22 = arith.constant 0 : index
    %38 = vector.load %arg4[%c0_21, %c0_22] : memref<1x64xf32, #tpu.memory_space<vmem>>, vector<1x64xf32>
    %39 = vector.shape_cast %38 : vector<1x64xf32> to vector<64xf32>
    %40 = vector.shape_cast %39 : vector<64xf32> to vector<1x64xf32>
    %41 = vector.broadcast %40 : vector<1x64xf32> to vector<32x64xf32>
    %42 = arith.addf %37, %41 : vector<32x64xf32>
    %cst_23 = arith.constant 0.000000e+00 : f32
    %43 = vector.broadcast %cst_23 : f32 to vector<32x64xf32>
    %44 = arith.maximumf %42, %43 : vector<32x64xf32>
    %cst_24 = arith.constant 0.000000e+00 : f32
    %45 = vector.broadcast %cst_24 : f32 to vector<2x64xf32>
    %46 = vector.extract_strided_slice %44 {offsets = [0, 0], sizes = [30, 64], strides = [1, 1]} : vector<32x64xf32> to vector<30x64xf32>
    %47 = tpu.concatenate %45, %46 in 0 : vector<2x64xf32>, vector<30x64xf32> -> vector<32x64xf32>
    %c2_i32_25 = arith.constant 2 : i32
    %48 = vector.broadcast %c2_i32_25 : i32 to vector<32x1xi32>
    %49 = arith.cmpi sge, %0, %48 : vector<32x1xi32>
    %cst_26 = arith.constant 0.000000e+00 : f32
    %50 = vector.shape_cast %49 : vector<32x1xi1> to vector<32x1xi1>
    %51 = vector.broadcast %50 : vector<32x1xi1> to vector<32x64xi1>
    %52 = vector.broadcast %cst_26 : f32 to vector<32x64xf32>
    %53 = arith.select %51, %47, %52 : vector<32x64xi1>, vector<32x64xf32>
    %c0_27 = arith.constant 0 : index
    %c0_28 = arith.constant 0 : index
    %c0_29 = arith.constant 0 : index
    %54 = vector.load %arg5[%c0_27, %c0_28, %c0_29] : memref<3x64x64xf32, #tpu.memory_space<vmem>>, vector<1x64x64xf32>
    %55 = vector.shape_cast %54 : vector<1x64x64xf32> to vector<64x64xf32>
    %cst_30 = arith.constant dense<0.000000e+00> : vector<32x64xf32>
    %56 = tpu.matmul %53, %55, %cst_30 {dimension_numbers = #tpu.dot_dimension_numbers<[1], [0], [0], [1], [0, 0, 1, 1], [], []>} : vector<32x64xf32>, vector<64x64xf32>, vector<32x64xf32> -> vector<32x64xf32>
    %cst_31 = arith.constant 0.000000e+00 : f32
    %57 = vector.broadcast %cst_31 : f32 to vector<1x64xf32>
    %58 = vector.extract_strided_slice %44 {offsets = [0, 0], sizes = [31, 64], strides = [1, 1]} : vector<32x64xf32> to vector<31x64xf32>
    %59 = tpu.concatenate %57, %58 in 0 : vector<1x64xf32>, vector<31x64xf32> -> vector<32x64xf32>
    %c1_i32_32 = arith.constant 1 : i32
    %60 = vector.broadcast %c1_i32_32 : i32 to vector<32x1xi32>
    %61 = arith.cmpi sge, %0, %60 : vector<32x1xi32>
    %cst_33 = arith.constant 0.000000e+00 : f32
    %62 = vector.shape_cast %61 : vector<32x1xi1> to vector<32x1xi1>
    %63 = vector.broadcast %62 : vector<32x1xi1> to vector<32x64xi1>
    %64 = vector.broadcast %cst_33 : f32 to vector<32x64xf32>
    %65 = arith.select %63, %59, %64 : vector<32x64xi1>, vector<32x64xf32>
    %c1_34 = arith.constant 1 : index
    %c0_35 = arith.constant 0 : index
    %c0_36 = arith.constant 0 : index
    %66 = vector.load %arg5[%c1_34, %c0_35, %c0_36] : memref<3x64x64xf32, #tpu.memory_space<vmem>>, vector<1x64x64xf32>
    %67 = vector.shape_cast %66 : vector<1x64x64xf32> to vector<64x64xf32>
    %cst_37 = arith.constant dense<0.000000e+00> : vector<32x64xf32>
    %68 = tpu.matmul %65, %67, %cst_37 {dimension_numbers = #tpu.dot_dimension_numbers<[1], [0], [0], [1], [0, 0, 1, 1], [], []>} : vector<32x64xf32>, vector<64x64xf32>, vector<32x64xf32> -> vector<32x64xf32>
    %69 = arith.addf %56, %68 : vector<32x64xf32>
    %c2_38 = arith.constant 2 : index
    %c0_39 = arith.constant 0 : index
    %c0_40 = arith.constant 0 : index
    %70 = vector.load %arg5[%c2_38, %c0_39, %c0_40] : memref<3x64x64xf32, #tpu.memory_space<vmem>>, vector<1x64x64xf32>
    %71 = vector.shape_cast %70 : vector<1x64x64xf32> to vector<64x64xf32>
    %cst_41 = arith.constant dense<0.000000e+00> : vector<32x64xf32>
    %72 = tpu.matmul %44, %71, %cst_41 {dimension_numbers = #tpu.dot_dimension_numbers<[1], [0], [0], [1], [0, 0, 1, 1], [], []>} : vector<32x64xf32>, vector<64x64xf32>, vector<32x64xf32> -> vector<32x64xf32>
    %73 = arith.addf %69, %72 : vector<32x64xf32>
    %c0_42 = arith.constant 0 : index
    %c0_43 = arith.constant 0 : index
    %74 = vector.load %arg6[%c0_42, %c0_43] : memref<1x64xf32, #tpu.memory_space<vmem>>, vector<1x64xf32>
    %75 = vector.shape_cast %74 : vector<1x64xf32> to vector<64xf32>
    %76 = vector.shape_cast %75 : vector<64xf32> to vector<1x64xf32>
    %77 = vector.broadcast %76 : vector<1x64xf32> to vector<32x64xf32>
    %78 = arith.addf %73, %77 : vector<32x64xf32>
    %cst_44 = arith.constant 0.000000e+00 : f32
    %79 = vector.broadcast %cst_44 : f32 to vector<32x64xf32>
    %80 = arith.maximumf %78, %79 : vector<32x64xf32>
    %81 = arith.addf %80, %8 : vector<32x64xf32>
    %cst_45 = arith.constant 0.000000e+00 : f32
    %82 = vector.broadcast %cst_45 : f32 to vector<32x64xf32>
    %83 = arith.maximumf %81, %82 : vector<32x64xf32>
    %c0_46 = arith.constant 0 : index
    %c0_47 = arith.constant 0 : index
    %84 = vector.load %arg13[%c0_46, %c0_47] : memref<64x128xf32, #tpu.memory_space<vmem>>, vector<64x128xf32>
    %cst_48 = arith.constant dense<0.000000e+00> : vector<32x128xf32>
    %85 = tpu.matmul %83, %84, %cst_48 {dimension_numbers = #tpu.dot_dimension_numbers<[1], [0], [0], [1], [0, 0, 1, 1], [], []>} : vector<32x64xf32>, vector<64x128xf32>, vector<32x128xf32> -> vector<32x128xf32>
    %c0_49 = arith.constant 0 : index
    %c0_50 = arith.constant 0 : index
    %86 = vector.load %arg14[%c0_49, %c0_50] : memref<1x128xf32, #tpu.memory_space<vmem>>, vector<1x128xf32>
    %87 = vector.shape_cast %86 : vector<1x128xf32> to vector<128xf32>
    %88 = vector.shape_cast %87 : vector<128xf32> to vector<1x128xf32>
    %89 = vector.broadcast %88 : vector<1x128xf32> to vector<32x128xf32>
    %90 = arith.addf %85, %89 : vector<32x128xf32>
    %cst_51 = arith.constant 0.000000e+00 : f32
    %91 = vector.broadcast %cst_51 : f32 to vector<4x64xf32>
    %92 = vector.extract_strided_slice %83 {offsets = [0, 0], sizes = [28, 64], strides = [1, 1]} : vector<32x64xf32> to vector<28x64xf32>
    %93 = tpu.concatenate %91, %92 in 0 : vector<4x64xf32>, vector<28x64xf32> -> vector<32x64xf32>
    %c4_i32 = arith.constant 4 : i32
    %94 = vector.broadcast %c4_i32 : i32 to vector<32x1xi32>
    %95 = arith.cmpi sge, %0, %94 : vector<32x1xi32>
    %cst_52 = arith.constant 0.000000e+00 : f32
    %96 = vector.shape_cast %95 : vector<32x1xi1> to vector<32x1xi1>
    %97 = vector.broadcast %96 : vector<32x1xi1> to vector<32x64xi1>
    %98 = vector.broadcast %cst_52 : f32 to vector<32x64xf32>
    %99 = arith.select %97, %93, %98 : vector<32x64xi1>, vector<32x64xf32>
    %c0_53 = arith.constant 0 : index
    %c0_54 = arith.constant 0 : index
    %c0_55 = arith.constant 0 : index
    %100 = vector.load %arg9[%c0_53, %c0_54, %c0_55] : memref<3x64x128xf32, #tpu.memory_space<vmem>>, vector<1x64x128xf32>
    %101 = vector.shape_cast %100 : vector<1x64x128xf32> to vector<64x128xf32>
    %cst_56 = arith.constant dense<0.000000e+00> : vector<32x128xf32>
    %102 = tpu.matmul %99, %101, %cst_56 {dimension_numbers = #tpu.dot_dimension_numbers<[1], [0], [0], [1], [0, 0, 1, 1], [], []>} : vector<32x64xf32>, vector<64x128xf32>, vector<32x128xf32> -> vector<32x128xf32>
    %cst_57 = arith.constant 0.000000e+00 : f32
    %103 = vector.broadcast %cst_57 : f32 to vector<2x64xf32>
    %104 = vector.extract_strided_slice %83 {offsets = [0, 0], sizes = [30, 64], strides = [1, 1]} : vector<32x64xf32> to vector<30x64xf32>
    %105 = tpu.concatenate %103, %104 in 0 : vector<2x64xf32>, vector<30x64xf32> -> vector<32x64xf32>
    %c2_i32_58 = arith.constant 2 : i32
    %106 = vector.broadcast %c2_i32_58 : i32 to vector<32x1xi32>
    %107 = arith.cmpi sge, %0, %106 : vector<32x1xi32>
    %cst_59 = arith.constant 0.000000e+00 : f32
    %108 = vector.shape_cast %107 : vector<32x1xi1> to vector<32x1xi1>
    %109 = vector.broadcast %108 : vector<32x1xi1> to vector<32x64xi1>
    %110 = vector.broadcast %cst_59 : f32 to vector<32x64xf32>
    %111 = arith.select %109, %105, %110 : vector<32x64xi1>, vector<32x64xf32>
    %c1_60 = arith.constant 1 : index
    %c0_61 = arith.constant 0 : index
    %c0_62 = arith.constant 0 : index
    %112 = vector.load %arg9[%c1_60, %c0_61, %c0_62] : memref<3x64x128xf32, #tpu.memory_space<vmem>>, vector<1x64x128xf32>
    %113 = vector.shape_cast %112 : vector<1x64x128xf32> to vector<64x128xf32>
    %cst_63 = arith.constant dense<0.000000e+00> : vector<32x128xf32>
    %114 = tpu.matmul %111, %113, %cst_63 {dimension_numbers = #tpu.dot_dimension_numbers<[1], [0], [0], [1], [0, 0, 1, 1], [], []>} : vector<32x64xf32>, vector<64x128xf32>, vector<32x128xf32> -> vector<32x128xf32>
    %115 = arith.addf %102, %114 : vector<32x128xf32>
    %c2_64 = arith.constant 2 : index
    %c0_65 = arith.constant 0 : index
    %c0_66 = arith.constant 0 : index
    %116 = vector.load %arg9[%c2_64, %c0_65, %c0_66] : memref<3x64x128xf32, #tpu.memory_space<vmem>>, vector<1x64x128xf32>
    %117 = vector.shape_cast %116 : vector<1x64x128xf32> to vector<64x128xf32>
    %cst_67 = arith.constant dense<0.000000e+00> : vector<32x128xf32>
    %118 = tpu.matmul %83, %117, %cst_67 {dimension_numbers = #tpu.dot_dimension_numbers<[1], [0], [0], [1], [0, 0, 1, 1], [], []>} : vector<32x64xf32>, vector<64x128xf32>, vector<32x128xf32> -> vector<32x128xf32>
    %119 = arith.addf %115, %118 : vector<32x128xf32>
    %c0_68 = arith.constant 0 : index
    %c0_69 = arith.constant 0 : index
    %120 = vector.load %arg10[%c0_68, %c0_69] : memref<1x128xf32, #tpu.memory_space<vmem>>, vector<1x128xf32>
    %121 = vector.shape_cast %120 : vector<1x128xf32> to vector<128xf32>
    %122 = vector.shape_cast %121 : vector<128xf32> to vector<1x128xf32>
    %123 = vector.broadcast %122 : vector<1x128xf32> to vector<32x128xf32>
    %124 = arith.addf %119, %123 : vector<32x128xf32>
    %cst_70 = arith.constant 0.000000e+00 : f32
    %125 = vector.broadcast %cst_70 : f32 to vector<32x128xf32>
    %126 = arith.maximumf %124, %125 : vector<32x128xf32>
    %cst_71 = arith.constant 0.000000e+00 : f32
    %127 = vector.broadcast %cst_71 : f32 to vector<4x128xf32>
    %128 = vector.extract_strided_slice %126 {offsets = [0, 0], sizes = [28, 128], strides = [1, 1]} : vector<32x128xf32> to vector<28x128xf32>
    %129 = tpu.concatenate %127, %128 in 0 : vector<4x128xf32>, vector<28x128xf32> -> vector<32x128xf32>
    %c4_i32_72 = arith.constant 4 : i32
    %130 = vector.broadcast %c4_i32_72 : i32 to vector<32x1xi32>
    %131 = arith.cmpi sge, %0, %130 : vector<32x1xi32>
    %cst_73 = arith.constant 0.000000e+00 : f32
    %132 = vector.shape_cast %131 : vector<32x1xi1> to vector<32x1xi1>
    %133 = vector.broadcast %132 : vector<32x1xi1> to vector<32x128xi1>
    %134 = vector.broadcast %cst_73 : f32 to vector<32x128xf32>
    %135 = arith.select %133, %129, %134 : vector<32x128xi1>, vector<32x128xf32>
    %c0_74 = arith.constant 0 : index
    %c0_75 = arith.constant 0 : index
    %c0_76 = arith.constant 0 : index
    %136 = vector.load %arg11[%c0_74, %c0_75, %c0_76] : memref<3x128x128xf32, #tpu.memory_space<vmem>>, vector<1x128x128xf32>
    %137 = vector.shape_cast %136 : vector<1x128x128xf32> to vector<128x128xf32>
    %cst_77 = arith.constant dense<0.000000e+00> : vector<32x128xf32>
    %138 = tpu.matmul %135, %137, %cst_77 {dimension_numbers = #tpu.dot_dimension_numbers<[1], [0], [0], [1], [0, 0, 1, 1], [], []>} : vector<32x128xf32>, vector<128x128xf32>, vector<32x128xf32> -> vector<32x128xf32>
    %cst_78 = arith.constant 0.000000e+00 : f32
    %139 = vector.broadcast %cst_78 : f32 to vector<2x128xf32>
    %140 = vector.extract_strided_slice %126 {offsets = [0, 0], sizes = [30, 128], strides = [1, 1]} : vector<32x128xf32> to vector<30x128xf32>
    %141 = tpu.concatenate %139, %140 in 0 : vector<2x128xf32>, vector<30x128xf32> -> vector<32x128xf32>
    %c2_i32_79 = arith.constant 2 : i32
    %142 = vector.broadcast %c2_i32_79 : i32 to vector<32x1xi32>
    %143 = arith.cmpi sge, %0, %142 : vector<32x1xi32>
    %cst_80 = arith.constant 0.000000e+00 : f32
    %144 = vector.shape_cast %143 : vector<32x1xi1> to vector<32x1xi1>
    %145 = vector.broadcast %144 : vector<32x1xi1> to vector<32x128xi1>
    %146 = vector.broadcast %cst_80 : f32 to vector<32x128xf32>
    %147 = arith.select %145, %141, %146 : vector<32x128xi1>, vector<32x128xf32>
    %c1_81 = arith.constant 1 : index
    %c0_82 = arith.constant 0 : index
    %c0_83 = arith.constant 0 : index
    %148 = vector.load %arg11[%c1_81, %c0_82, %c0_83] : memref<3x128x128xf32, #tpu.memory_space<vmem>>, vector<1x128x128xf32>
    %149 = vector.shape_cast %148 : vector<1x128x128xf32> to vector<128x128xf32>
    %cst_84 = arith.constant dense<0.000000e+00> : vector<32x128xf32>
    %150 = tpu.matmul %147, %149, %cst_84 {dimension_numbers = #tpu.dot_dimension_numbers<[1], [0], [0], [1], [0, 0, 1, 1], [], []>} : vector<32x128xf32>, vector<128x128xf32>, vector<32x128xf32> -> vector<32x128xf32>
    %151 = arith.addf %138, %150 : vector<32x128xf32>
    %c2_85 = arith.constant 2 : index
    %c0_86 = arith.constant 0 : index
    %c0_87 = arith.constant 0 : index
    %152 = vector.load %arg11[%c2_85, %c0_86, %c0_87] : memref<3x128x128xf32, #tpu.memory_space<vmem>>, vector<1x128x128xf32>
    %153 = vector.shape_cast %152 : vector<1x128x128xf32> to vector<128x128xf32>
    %cst_88 = arith.constant dense<0.000000e+00> : vector<32x128xf32>
    %154 = tpu.matmul %126, %153, %cst_88 {dimension_numbers = #tpu.dot_dimension_numbers<[1], [0], [0], [1], [0, 0, 1, 1], [], []>} : vector<32x128xf32>, vector<128x128xf32>, vector<32x128xf32> -> vector<32x128xf32>
    %155 = arith.addf %151, %154 : vector<32x128xf32>
    %c0_89 = arith.constant 0 : index
    %c0_90 = arith.constant 0 : index
    %156 = vector.load %arg12[%c0_89, %c0_90] : memref<1x128xf32, #tpu.memory_space<vmem>>, vector<1x128xf32>
    %157 = vector.shape_cast %156 : vector<1x128xf32> to vector<128xf32>
    %158 = vector.shape_cast %157 : vector<128xf32> to vector<1x128xf32>
    %159 = vector.broadcast %158 : vector<1x128xf32> to vector<32x128xf32>
    %160 = arith.addf %155, %159 : vector<32x128xf32>
    %cst_91 = arith.constant 0.000000e+00 : f32
    %161 = vector.broadcast %cst_91 : f32 to vector<32x128xf32>
    %162 = arith.maximumf %160, %161 : vector<32x128xf32>
    %163 = arith.addf %162, %90 : vector<32x128xf32>
    %cst_92 = arith.constant 0.000000e+00 : f32
    %164 = vector.broadcast %cst_92 : f32 to vector<32x128xf32>
    %165 = arith.maximumf %163, %164 : vector<32x128xf32>
    %166 = vector.extract_strided_slice %165 {offsets = [0, 0], sizes = [16, 128], strides = [1, 1]} : vector<32x128xf32> to vector<16x128xf32>
    %cst_93 = arith.constant dense<0.000000e+00> : vector<128xf32>
    %167 = vector.multi_reduction <add>, %166, %cst_93 [0] : vector<16x128xf32> to vector<128xf32>
    %168 = vector.shape_cast %167 : vector<128xf32> to vector<1x128xf32>
    %cst_94 = arith.constant 6.250000e-02 : f32
    %169 = vector.broadcast %cst_94 : f32 to vector<1x128xf32>
    %170 = arith.mulf %168, %169 : vector<1x128xf32>
    %cst_95 = arith.constant dense<0xFF800000> : vector<128xf32>
    %171 = vector.multi_reduction <maximumf>, %166, %cst_95 [0] : vector<16x128xf32> to vector<128xf32>
    %172 = vector.shape_cast %171 : vector<128xf32> to vector<1x128xf32>
    %173 = vector.extract_strided_slice %165 {offsets = [16, 0], sizes = [16, 128], strides = [1, 1]} : vector<32x128xf32> to vector<16x128xf32>
    %cst_96 = arith.constant dense<0.000000e+00> : vector<128xf32>
    %174 = vector.multi_reduction <add>, %173, %cst_96 [0] : vector<16x128xf32> to vector<128xf32>
    %175 = vector.shape_cast %174 : vector<128xf32> to vector<1x128xf32>
    %cst_97 = arith.constant 6.250000e-02 : f32
    %176 = vector.broadcast %cst_97 : f32 to vector<1x128xf32>
    %177 = arith.mulf %175, %176 : vector<1x128xf32>
    %cst_98 = arith.constant dense<0xFF800000> : vector<128xf32>
    %178 = vector.multi_reduction <maximumf>, %173, %cst_98 [0] : vector<16x128xf32> to vector<128xf32>
    %179 = vector.shape_cast %178 : vector<128xf32> to vector<1x128xf32>
    %180 = tpu.concatenate %170, %177 in 0 : vector<1x128xf32>, vector<1x128xf32> -> vector<2x128xf32>
    %181 = tpu.concatenate %172, %179 in 0 : vector<1x128xf32>, vector<1x128xf32> -> vector<2x128xf32>
    %c0_99 = arith.constant 0 : index
    %c0_100 = arith.constant 0 : index
    %182 = vector.load %arg15[%c0_99, %c0_100] : memref<128x8xf32, #tpu.memory_space<vmem>>, vector<128x8xf32>
    %cst_101 = arith.constant dense<0.000000e+00> : vector<2x8xf32>
    %183 = tpu.matmul %180, %182, %cst_101 {dimension_numbers = #tpu.dot_dimension_numbers<[1], [0], [0], [1], [0, 0, 1, 1], [], []>} : vector<2x128xf32>, vector<128x8xf32>, vector<2x8xf32> -> vector<2x8xf32>
    %cst_102 = arith.constant 0.000000e+00 : f32
    %184 = vector.broadcast %cst_102 : f32 to vector<2x8xf32>
    %185 = arith.maximumf %183, %184 : vector<2x8xf32>
    %c0_103 = arith.constant 0 : index
    %c0_104 = arith.constant 0 : index
    %186 = vector.load %arg16[%c0_103, %c0_104] : memref<8x128xf32, #tpu.memory_space<vmem>>, vector<8x128xf32>
    %cst_105 = arith.constant dense<0.000000e+00> : vector<2x128xf32>
    %187 = tpu.matmul %185, %186, %cst_105 {dimension_numbers = #tpu.dot_dimension_numbers<[1], [0], [0], [1], [0, 0, 1, 1], [], []>} : vector<2x8xf32>, vector<8x128xf32>, vector<2x128xf32> -> vector<2x128xf32>
    %c0_106 = arith.constant 0 : index
    %c0_107 = arith.constant 0 : index
    %188 = vector.load %arg15[%c0_106, %c0_107] : memref<128x8xf32, #tpu.memory_space<vmem>>, vector<128x8xf32>
    %cst_108 = arith.constant dense<0.000000e+00> : vector<2x8xf32>
    %189 = tpu.matmul %181, %188, %cst_108 {dimension_numbers = #tpu.dot_dimension_numbers<[1], [0], [0], [1], [0, 0, 1, 1], [], []>} : vector<2x128xf32>, vector<128x8xf32>, vector<2x8xf32> -> vector<2x8xf32>
    %cst_109 = arith.constant 0.000000e+00 : f32
    %190 = vector.broadcast %cst_109 : f32 to vector<2x8xf32>
    %191 = arith.maximumf %189, %190 : vector<2x8xf32>
    %c0_110 = arith.constant 0 : index
    %c0_111 = arith.constant 0 : index
    %192 = vector.load %arg16[%c0_110, %c0_111] : memref<8x128xf32, #tpu.memory_space<vmem>>, vector<8x128xf32>
    %cst_112 = arith.constant dense<0.000000e+00> : vector<2x128xf32>
    %193 = tpu.matmul %191, %192, %cst_112 {dimension_numbers = #tpu.dot_dimension_numbers<[1], [0], [0], [1], [0, 0, 1, 1], [], []>} : vector<2x8xf32>, vector<8x128xf32>, vector<2x128xf32> -> vector<2x128xf32>
    %194 = arith.addf %187, %193 : vector<2x128xf32>
    %cst_113 = arith.constant 0.000000e+00 : f32
    %195 = vector.broadcast %cst_113 : f32 to vector<2x128xf32>
    %196 = arith.subf %195, %194 : vector<2x128xf32>
    %197 = math.exp %196 : vector<2x128xf32>
    %cst_114 = arith.constant 1.000000e+00 : f32
    %198 = vector.broadcast %cst_114 : f32 to vector<2x128xf32>
    %199 = arith.addf %198, %197 : vector<2x128xf32>
    %cst_115 = arith.constant 1.000000e+00 : f32
    %200 = vector.broadcast %cst_115 : f32 to vector<2x128xf32>
    %201 = arith.divf %200, %199 : vector<2x128xf32>
    %202 = arith.mulf %201, %180 : vector<2x128xf32>
    %cst_116 = arith.constant dense<0.000000e+00> : vector<2xf32>
    %203 = vector.multi_reduction <add>, %202, %cst_116 [1] : vector<2x128xf32> to vector<2xf32>
    %204 = vector.shape_cast %203 : vector<2xf32> to vector<2x1xf32>
    %cst_117 = arith.constant 1.280000e+02 : f32
    %205 = vector.broadcast %cst_117 : f32 to vector<2x1xf32>
    %206 = arith.divf %204, %205 : vector<2x1xf32>
    %207 = vector.broadcast %206 : vector<2x1xf32> to vector<2x128xf32>
    %208 = arith.subf %202, %207 : vector<2x128xf32>
    %209 = vector.broadcast %206 : vector<2x1xf32> to vector<2x128xf32>
    %210 = arith.subf %202, %209 : vector<2x128xf32>
    %211 = arith.mulf %208, %210 : vector<2x128xf32>
    %cst_118 = arith.constant dense<0.000000e+00> : vector<2xf32>
    %212 = vector.multi_reduction <add>, %211, %cst_118 [1] : vector<2x128xf32> to vector<2xf32>
    %213 = vector.shape_cast %212 : vector<2xf32> to vector<2x1xf32>
    %cst_119 = arith.constant 1.280000e+02 : f32
    %214 = vector.broadcast %cst_119 : f32 to vector<2x1xf32>
    %215 = arith.divf %213, %214 : vector<2x1xf32>
    %216 = vector.broadcast %206 : vector<2x1xf32> to vector<2x128xf32>
    %217 = arith.subf %202, %216 : vector<2x128xf32>
    %cst_120 = arith.constant 9.99999974E-6 : f32
    %218 = vector.broadcast %cst_120 : f32 to vector<2x1xf32>
    %219 = arith.addf %215, %218 : vector<2x1xf32>
    %220 = math.rsqrt %219 : vector<2x1xf32>
    %221 = vector.broadcast %220 : vector<2x1xf32> to vector<2x128xf32>
    %222 = arith.mulf %217, %221 : vector<2x128xf32>
    %c0_121 = arith.constant 0 : index
    %c0_122 = arith.constant 0 : index
    %223 = vector.load %arg17[%c0_121, %c0_122] : memref<1x128xf32, #tpu.memory_space<vmem>>, vector<1x128xf32>
    %224 = vector.shape_cast %223 : vector<1x128xf32> to vector<128xf32>
    %225 = vector.shape_cast %224 : vector<128xf32> to vector<1x128xf32>
    %226 = vector.broadcast %225 : vector<1x128xf32> to vector<2x128xf32>
    %227 = arith.mulf %222, %226 : vector<2x128xf32>
    %c0_123 = arith.constant 0 : index
    %c0_124 = arith.constant 0 : index
    %228 = vector.load %arg18[%c0_123, %c0_124] : memref<1x128xf32, #tpu.memory_space<vmem>>, vector<1x128xf32>
    %229 = vector.shape_cast %228 : vector<1x128xf32> to vector<128xf32>
    %230 = vector.shape_cast %229 : vector<128xf32> to vector<1x128xf32>
    %231 = vector.broadcast %230 : vector<1x128xf32> to vector<2x128xf32>
    %232 = arith.addf %227, %231 : vector<2x128xf32>
    %c0_125 = arith.constant 0 : index
    %c0_126 = arith.constant 0 : index
    %233 = vector.load %arg19[%c0_125, %c0_126] : memref<128x128xf32, #tpu.memory_space<vmem>>, vector<128x128xf32>
    %cst_127 = arith.constant dense<0.000000e+00> : vector<2x128xf32>
    %234 = tpu.matmul %232, %233, %cst_127 {dimension_numbers = #tpu.dot_dimension_numbers<[1], [0], [0], [1], [0, 0, 1, 1], [], []>} : vector<2x128xf32>, vector<128x128xf32>, vector<2x128xf32> -> vector<2x128xf32>
    %c0_128 = arith.constant 0 : index
    %c0_129 = arith.constant 0 : index
    %235 = vector.load %arg20[%c0_128, %c0_129] : memref<1x128xf32, #tpu.memory_space<vmem>>, vector<1x128xf32>
    %236 = vector.shape_cast %235 : vector<1x128xf32> to vector<128xf32>
    %237 = vector.shape_cast %236 : vector<128xf32> to vector<1x128xf32>
    %238 = vector.broadcast %237 : vector<1x128xf32> to vector<2x128xf32>
    %239 = arith.addf %234, %238 : vector<2x128xf32>
    %cst_130 = arith.constant 0.000000e+00 : f32
    %240 = vector.broadcast %cst_130 : f32 to vector<2x128xf32>
    %241 = arith.maximumf %239, %240 : vector<2x128xf32>
    %c0_131 = arith.constant 0 : index
    %c0_132 = arith.constant 0 : index
    %242 = vector.load %arg21[%c0_131, %c0_132] : memref<128x128xf32, #tpu.memory_space<vmem>>, vector<128x128xf32>
    %cst_133 = arith.constant dense<0.000000e+00> : vector<2x128xf32>
    %243 = tpu.matmul %241, %242, %cst_133 {dimension_numbers = #tpu.dot_dimension_numbers<[1], [0], [0], [1], [0, 0, 1, 1], [], []>} : vector<2x128xf32>, vector<128x128xf32>, vector<2x128xf32> -> vector<2x128xf32>
    %c0_134 = arith.constant 0 : index
    %c0_135 = arith.constant 0 : index
    %244 = vector.load %arg22[%c0_134, %c0_135] : memref<1x128xf32, #tpu.memory_space<vmem>>, vector<1x128xf32>
    %245 = vector.shape_cast %244 : vector<1x128xf32> to vector<128xf32>
    %246 = vector.shape_cast %245 : vector<128xf32> to vector<1x128xf32>
    %247 = vector.broadcast %246 : vector<1x128xf32> to vector<2x128xf32>
    %248 = arith.addf %243, %247 : vector<2x128xf32>
    %c0_136 = arith.constant 0 : index
    %c0_137 = arith.constant 0 : index
    %249 = vector.load %arg23[%c0_136, %c0_137] : memref<2x128xf32, #tpu.memory_space<vmem>>, vector<2x128xf32>
    tpu.vector_store %arg23[%c0_136, %c0_137], %248 {strides = array<i32>} : memref<2x128xf32, #tpu.memory_space<vmem>>, vector<2x128xf32>,
    return
  }
  func.func @transform_0(%arg0: i32) -> (i32, i32) {
    %c0_i32 = arith.constant 0 : i32
    %c0_i32_0 = arith.constant 0 : i32
    %c0_i32_1 = arith.constant 0 : i32
    return %c0_i32, %c0_i32_0 : i32, i32
  }
  func.func @transform_1(%arg0: i32) -> (i32, i32) {
    %c0_i32 = arith.constant 0 : i32
    %c0_i32_0 = arith.constant 0 : i32
    %c0_i32_1 = arith.constant 0 : i32
    return %c0_i32, %c0_i32_0 : i32, i32
  }
  func.func @transform_2(%arg0: i32) -> (i32, i32, i32) {
    %c0_i32 = arith.constant 0 : i32
    %c0_i32_0 = arith.constant 0 : i32
    %c0_i32_1 = arith.constant 0 : i32
    %c0_i32_2 = arith.constant 0 : i32
    return %c0_i32, %c0_i32_0, %c0_i32_1 : i32, i32, i32
  }
  func.func @transform_3(%arg0: i32) -> (i32, i32) {
    %c0_i32 = arith.constant 0 : i32
    %c0_i32_0 = arith.constant 0 : i32
    %c0_i32_1 = arith.constant 0 : i32
    return %c0_i32, %c0_i32_0 : i32, i32
  }
  func.func @transform_4(%arg0: i32) -> (i32, i32, i32) {
    %c0_i32 = arith.constant 0 : i32
    %c0_i32_0 = arith.constant 0 : i32
    %c0_i32_1 = arith.constant 0 : i32
    %c0_i32_2 = arith.constant 0 : i32
    return %c0_i32, %c0_i32_0, %c0_i32_1 : i32, i32, i32
  }
  func.func @transform_5(%arg0: i32) -> (i32, i32) {
    %c0_i32 = arith.constant 0 : i32
    %c0_i32_0 = arith.constant 0 : i32
    %c0_i32_1 = arith.constant 0 : i32
    return %c0_i32, %c0_i32_0 : i32, i32
  }
  func.func @transform_6(%arg0: i32) -> (i32, i32) {
    %c0_i32 = arith.constant 0 : i32
    %c0_i32_0 = arith.constant 0 : i32
    %c0_i32_1 = arith.constant 0 : i32
    return %c0_i32, %c0_i32_0 : i32, i32
  }
  func.func @transform_7(%arg0: i32) -> (i32, i32) {
    %c0_i32 = arith.constant 0 : i32
    %c0_i32_0 = arith.constant 0 : i32
    %c0_i32_1 = arith.constant 0 : i32
    return %c0_i32, %c0_i32_0 : i32, i32
  }
  func.func @transform_8(%arg0: i32) -> (i32, i32, i32) {
    %c0_i32 = arith.constant 0 : i32
    %c0_i32_0 = arith.constant 0 : i32
    %c0_i32_1 = arith.constant 0 : i32
    %c0_i32_2 = arith.constant 0 : i32
    return %c0_i32, %c0_i32_0, %c0_i32_1 : i32, i32, i32
  }
  func.func @transform_9(%arg0: i32) -> (i32, i32) {
    %c0_i32 = arith.constant 0 : i32
    %c0_i32_0 = arith.constant 0 : i32
    %c0_i32_1 = arith.constant 0 : i32
    return %c0_i32, %c0_i32_0 : i32, i32
  }
  func.func @transform_10(%arg0: i32) -> (i32, i32, i32) {
    %c0_i32 = arith.constant 0 : i32
    %c0_i32_0 = arith.constant 0 : i32
    %c0_i32_1 = arith.constant 0 : i32
    %c0_i32_2 = arith.constant 0 : i32
    return %c0_i32, %c0_i32_0, %c0_i32_1 : i32, i32, i32
  }
  func.func @transform_11(%arg0: i32) -> (i32, i32) {
    %c0_i32 = arith.constant 0 : i32
    %c0_i32_0 = arith.constant 0 : i32
    %c0_i32_1 = arith.constant 0 : i32
    return %c0_i32, %c0_i32_0 : i32, i32
  }
  func.func @transform_12(%arg0: i32) -> (i32, i32) {
    %c0_i32 = arith.constant 0 : i32
    %c0_i32_0 = arith.constant 0 : i32
    %c0_i32_1 = arith.constant 0 : i32
    return %c0_i32, %c0_i32_0 : i32, i32
  }
  func.func @transform_13(%arg0: i32) -> (i32, i32) {
    %c0_i32 = arith.constant 0 : i32
    %c0_i32_0 = arith.constant 0 : i32
    %c0_i32_1 = arith.constant 0 : i32
    return %c0_i32, %c0_i32_0 : i32, i32
  }
  func.func @transform_14(%arg0: i32) -> (i32, i32) {
    %c0_i32 = arith.constant 0 : i32
    %c0_i32_0 = arith.constant 0 : i32
    %c0_i32_1 = arith.constant 0 : i32
    return %c0_i32, %c0_i32_0 : i32, i32
  }
  func.func @transform_15(%arg0: i32) -> (i32, i32) {
    %c0_i32 = arith.constant 0 : i32
    %c0_i32_0 = arith.constant 0 : i32
    %c0_i32_1 = arith.constant 0 : i32
    return %c0_i32, %c0_i32_0 : i32, i32
  }
  func.func @transform_16(%arg0: i32) -> (i32, i32) {
    %c0_i32 = arith.constant 0 : i32
    %c0_i32_0 = arith.constant 0 : i32
    %c0_i32_1 = arith.constant 0 : i32
    return %c0_i32, %c0_i32_0 : i32, i32
  }
  func.func @transform_17(%arg0: i32) -> (i32, i32) {
    %c0_i32 = arith.constant 0 : i32
    %c0_i32_0 = arith.constant 0 : i32
    %c0_i32_1 = arith.constant 0 : i32
    return %c0_i32, %c0_i32_0 : i32, i32
  }
  func.func @transform_18(%arg0: i32) -> (i32, i32) {
    %c0_i32 = arith.constant 0 : i32
    %c0_i32_0 = arith.constant 0 : i32
    %c0_i32_1 = arith.constant 0 : i32
    return %c0_i32, %c0_i32_0 : i32, i32
  }
  func.func @transform_19(%arg0: i32) -> (i32, i32) {
    %c0_i32 = arith.constant 0 : i32
    %c0_i32_0 = arith.constant 0 : i32
    %c0_i32_1 = arith.constant 0 : i32
    return %c0_i32, %c0_i32_0 : i32, i32
  }
  func.func @transform_20(%arg0: i32) -> (i32, i32) {
    %c0_i32 = arith.constant 0 : i32
    %c0_i32_0 = arith.constant 0 : i32
    %c0_i32_1 = arith.constant 0 : i32
    return %c0_i32, %c0_i32_0 : i32, i32
  }
  func.func @transform_21(%arg0: i32) -> (i32, i32) {
    %c0_i32 = arith.constant 0 : i32
    %c0_i32_0 = arith.constant 0 : i32
    %c0_i32_1 = arith.constant 0 : i32
    return %c0_i32, %c0_i32_0 : i32, i32
  }
  func.func @transform_22(%arg0: i32) -> (i32, i32) {
    %c0_i32 = arith.constant 0 : i32
    %c0_i32_0 = arith.constant 0 : i32
    %c0_i32_1 = arith.constant 0 : i32
    return %c0_i32, %c0_i32_0 : i32, i32
  }
}

</mosaic_0001>

<bundles_post_ra>
// kernel: tpu_custom_call.1
= control target key start
LH: loop header
LB: loop body
LE: loop exit
PB: predicated region body
PF: predicated region fallthrough
CT: control target
= control target key end

     0   :  { %s4484_s0 = inlined_call_operand.hbm [shape: f32[32,32], index: 0, kind: input, shape index: {}]   ;;  %s4485_s1 = inlined_call_operand.vmem [shape: s32[32,1], index: 1, kind: input, shape index: {}]   ;;  %s4486_s2 = inlined_call_operand.hbm [shape: f32[3,32,64], index: 2, kind: input, shape index: {}]   ;;  %s4487_s3 = inlined_call_operand.vmem [shape: f32[1,64], index: 3, kind: input, shape index: {}]   ;;  %s4488_s4 = inlined_call_operand.hbm [shape: f32[3,64,64], index: 4, kind: input, shape index: {}]   ;;  %s4489_s5 = inlined_call_operand.hbm [shape: f32[1,64], index: 5, kind: input, shape index: {}]   ;;  %s4490_s6 = inlined_call_operand.hbm [shape: f32[32,64], index: 6, kind: input, shape index: {}]   ;;  %s4491_s7 = inlined_call_operand.hbm [shape: f32[1,64], index: 7, kind: input, shape index: {}]   ;;  %s4492_s8 = inlined_call_operand.hbm [shape: f32[3,64,128], index: 8, kind: input, shape index: {}]   ;;  %s4493_s9 = inlined_call_operand.hbm [shape: f32[1,128], index: 9, kind: input, shape index: {}]   ;;  %s4494_s10 = inlined_call_operand.hbm [shape: f32[3,128,128], index: 10, kind: input, shape index: {}]   ;;  %s4495_s11 = inlined_call_operand.hbm [shape: f32[1,128], index: 11, kind: input, shape index: {}]   ;;  %s4496_s12 = inlined_call_operand.vmem [shape: f32[64,128], index: 12, kind: input, shape index: {}]   ;;  %s4497_s13 = inlined_call_operand.hbm [shape: f32[1,128], index: 13, kind: input, shape index: {}]   ;;  %s4498_s14 = inlined_call_operand.vmem [shape: f32[128,8], index: 14, kind: input, shape index: {}]   ;;  %s4499_s15 = inlined_call_operand.vmem [shape: f32[8,128], index: 15, kind: input, shape index: {}]   ;;  %s4500_s16 = inlined_call_operand.hbm [shape: f32[1,128], index: 16, kind: input, shape index: {}]   ;;  %s4501_s17 = inlined_call_operand.hbm [shape: f32[1,128], index: 17, kind: input, shape index: {}]   ;;  %s4502_s18 = inlined_call_operand.vmem [shape: f32[128,128], index: 18, kind: input, shape index: {}]   ;;  %s4503_s19 = inlined_call_operand.hbm [shape: f32[1,128], index: 19, kind: input, shape index: {}]   ;;  %s4504_s20 = inlined_call_operand.hbm [shape: f32[128,128], index: 20, kind: input, shape index: {}]   ;;  %s4505_s21 = inlined_call_operand.vmem [shape: f32[1,128], index: 21, kind: input, shape index: {}]   ;;  %s4506_s22 = inlined_call_operand.hbm [shape: f32[2,128], index: 22, kind: output, shape index: {}]  }
   0x1   :  { %4508 = sst [smem:[#allocation36_spill]] %s4484_s0 }
   0x2   :  { %4509 = sst [smem:[#allocation37_spill]] %s4485_s1 }
   0x3   :  { %4510 = sst [smem:[#allocation38_spill]] %s4486_s2 }
   0x4   :  { %4511 = sst [smem:[#allocation39_spill]] %s4487_s3 }
   0x5   :  { %4512 = sst [smem:[#allocation40_spill]] %s4488_s4 }
   0x6   :  { %4513 = sst [smem:[#allocation41_spill]] %s4489_s5 }
   0x7   :  { %4514 = sst [smem:[#allocation42_spill]] %s4490_s6 }
   0x8   :  { %4515 = sst [smem:[#allocation43_spill]] %s4506_s22 }
   0x9   :  { %27 = vsyncpa [#allocation3], 0 }
   0xa   :  { %28 = vsyncpa [#allocation6], 0 }
   0xb   :  { %29 = vsyncpa [#allocation9], 0 }
   0xc   :  { %30 = vsyncpa [#allocation12], 0 }
   0xd   :  { %31 = vsyncpa [#allocation15], 0 }
   0xe   :  { %32 = vsyncpa [#allocation18], 0 }
   0xf   :  { %33 = vsyncpa [#allocation21], 0 }
  0x10   :  { %34 = vsyncpa [#allocation24], 0 }
  0x11   :  { %35 = vsyncpa [#allocation4], 0  ;;  %s3746_s3 = smov [#allocation5]   ;;  %s3747_s29 = smov [#allocation8]  }
  0x12   :  { %s55_s28 = sshll.u32 %s3746_s3, 4  ;;  %s82_s30 = sshll.u32 %s3747_s29, 4  ;;  %s56_s28 = int_to_ptr.vmem [resolvable:$true] %s55_s28  ;;  %s83_s30 = int_to_ptr.vmem [resolvable:$true] %s82_s30 }
  0x13   :  { %s3416_s4 = scalar_lea.vmem %s56_s28, 1536  ;;  %p3421_p1 = scmp.lt.s32.totalorder %s56_s28, %s56_s28 }
  0x14   :  { %p3417_p0 = scmp.ne.s32.totalorder %s56_s28, %s3416_s4  ;;  %p3422_p2 = scmp.lt.s32.totalorder %s3416_s4, %s3416_s4 }
  0x16   :  { %p3423_p3 = por %p3422_p2, %p3421_p1 }
  0x18   :  { %p3424_p4 = pnand %p3423_p3, %p3417_p0 }
  0x1a   :  { %3427 = shalt.err (!%p3424_p4)
}
  0x1b   :  { %s3748_s0 = smov 128   ;;  %s3749_s23 = smov 8  }
  0x1c   :  { %s4516_s24 = sld [smem:[#allocation38_spill]]  ;;  %s3436_s6 = scalar_lea.vmem %s83_s30, 16 }
  0x1d   :  { %p3437_p5 = scmp.ne.s32.totalorder %s83_s30, %s3436_s6  ;;  %s3440_s25 = scalar_lea.vmem %s83_s30, 32 }
  0x1e   :  { %p3441_p6 = scmp.lt.s32.totalorder %s83_s30, %s83_s30  ;;  %p3442_p7 = scmp.lt.s32.totalorder %s3440_s25, %s3436_s6 }
  0x20   :  { %p3443_p8 = por %p3442_p7, %p3441_p6 }
  0x22   :  { %61 = dma.hbm_to_vmem [thread:$0]  %s4516_s24, 1536, %s56_s28, [#allocation6], %s3748_s0, %s3748_s0, %s3749_s23  }
  0x23   :  { %p3444_p9 = pnand %p3443_p8, %p3437_p5 }
  0x25   :  { %3447 = shalt.err (!%p3444_p9)
}
  0x26   :  { %s4517_s27 = sld [smem:[#allocation41_spill]]  ;;  %s3750_s3 = smov [#allocation11]  }
  0x27   :  { %s104_s29 = sshll.u32 %s3750_s3, 4  ;;  %s3751_s4 = smov [#allocation14]   ;;  %s105_s29 = int_to_ptr.vmem [resolvable:$true] %s104_s29 }
  0x28   :  { %s126_s22 = sshll.u32 %s3751_s4, 4  ;;  %s3456_s1 = scalar_lea.vmem %s105_s29, 16  ;;  %s127_s22 = int_to_ptr.vmem [resolvable:$true] %s126_s22 }
  0x29   :  { %p3457_p10 = scmp.ne.s32.totalorder %s105_s29, %s3456_s1  ;;  %s3460_s28 = scalar_lea.vmem %s105_s29, 32 }
  0x2a   :  { %p3461_p11 = scmp.lt.s32.totalorder %s105_s29, %s105_s29  ;;  %p3462_p12 = scmp.lt.s32.totalorder %s3460_s28, %s3456_s1 }
  0x2c   :  { %85 = dma.hbm_to_vmem [thread:$0]  %s4517_s27, 16, %s83_s30, [#allocation9]  }
  0x2d   :  { %p3463_p13 = por %p3462_p12, %p3461_p11 }
  0x2f   :  { %p3464_p0 = pnand %p3463_p13, %p3457_p10 }
  0x31   :  { %3467 = shalt.err (!%p3464_p0)
}
  0x32   :  { %107 = dma.hbm_to_vmem [thread:$0]  %s4491_s7, 16, %s105_s29, [#allocation12]  }
  0x33   :  { %s3476_s6 = scalar_lea.vmem %s127_s22, 16  ;;  %s3480_s30 = scalar_lea.vmem %s127_s22, 32 }
  0x34   :  { %p3477_p1 = scmp.ne.s32.totalorder %s127_s22, %s3476_s6  ;;  %p3481_p2 = scmp.lt.s32.totalorder %s127_s22, %s127_s22 }
  0x35   :  { %p3482_p3 = scmp.lt.s32.totalorder %s3480_s30, %s3476_s6 }
  0x37   :  { %p3483_p4 = por %p3482_p3, %p3481_p2 }
  0x39   :  { %p3484_p5 = pnand %p3483_p4, %p3477_p1 }
  0x3b   :  { %3487 = shalt.err (!%p3484_p5)
}
  0x3c   :  { %129 = dma.hbm_to_vmem [thread:$0]  %s4493_s9, 16, %s127_s22, [#allocation15]  }
  0x3d   :  { %s3752_s2 = smov [#allocation17]   ;;  %s3753_s3 = smov [#allocation20]  }
  0x3e   :  { %s148_s27 = sshll.u32 %s3752_s2, 4  ;;  %s174_s4 = sshll.u32 %s3753_s3, 4  ;;  %s149_s27 = int_to_ptr.vmem [resolvable:$true] %s148_s27  ;;  %s175_s4 = int_to_ptr.vmem [resolvable:$true] %s174_s4 }
  0x3f   :  { %s3496_s1 = scalar_lea.vmem %s149_s27, 16  ;;  %s3500_s7 = scalar_lea.vmem %s149_s27, 32 }
  0x40   :  { %p3497_p6 = scmp.ne.s32.totalorder %s149_s27, %s3496_s1  ;;  %p3501_p7 = scmp.lt.s32.totalorder %s149_s27, %s149_s27 }
  0x41   :  { %p3502_p8 = scmp.lt.s32.totalorder %s3500_s7, %s3496_s1 }
  0x43   :  { %p3503_p9 = por %p3502_p8, %p3501_p7 }
  0x45   :  { %p3504_p10 = pnand %p3503_p9, %p3497_p6 }
  0x47   :  { %3507 = shalt.err (!%p3504_p10)
}
  0x48   :  { %151 = dma.hbm_to_vmem [thread:$0]  %s4495_s11, 16, %s149_s27, [#allocation18]  }
  0x49   :  { %s3516_s5 = scalar_lea.vmem %s175_s4, 16  ;;  %s3520_s9 = scalar_lea.vmem %s175_s4, 32 }
  0x4a   :  { %p3517_p11 = scmp.ne.s32.totalorder %s175_s4, %s3516_s5  ;;  %p3521_p12 = scmp.lt.s32.totalorder %s175_s4, %s175_s4 }
  0x4b   :  { %p3522_p13 = scmp.lt.s32.totalorder %s3520_s9, %s3516_s5 }
  0x4d   :  { %p3523_p0 = por %p3522_p13, %p3521_p12 }
  0x4f   :  { %p3524_p1 = pnand %p3523_p0, %p3517_p11 }
  0x51   :  { %3527 = shalt.err (!%p3524_p1)
}
  0x52   :  { %177 = dma.hbm_to_vmem [thread:$0]  %s4500_s16, 16, %s175_s4, [#allocation21]  }
  0x53   :  { %s3754_s6 = smov [#allocation23]   ;;  %s3755_s25 = smov [#allocation2]  }
  0x54   :  { %s196_s30 = sshll.u32 %s3754_s6, 4  ;;  %s41_s26 = sshll.u32 %s3755_s25, 4  ;;  %s197_s30 = int_to_ptr.vmem [resolvable:$true] %s196_s30  ;;  %s42_s26 = int_to_ptr.vmem [resolvable:$true] %s41_s26 }
  0x55   :  { %s3536_s2 = scalar_lea.vmem %s197_s30, 16  ;;  %s3540_s11 = scalar_lea.vmem %s197_s30, 32 }
  0x56   :  { %p3537_p2 = scmp.ne.s32.totalorder %s197_s30, %s3536_s2  ;;  %p3541_p3 = scmp.lt.s32.totalorder %s197_s30, %s197_s30 }
  0x57   :  { %p3542_p4 = scmp.lt.s32.totalorder %s3540_s11, %s3536_s2 }
  0x59   :  { %p3543_p5 = por %p3542_p4, %p3541_p3 }
  0x5b   :  { %p3544_p6 = pnand %p3543_p5, %p3537_p2 }
  0x5d   :  { %3547 = shalt.err (!%p3544_p6)
}
  0x5e   :  { %199 = dma.hbm_to_vmem [thread:$0]  %s4503_s19, 16, %s197_s30, [#allocation24]  }
  0x5f   :  { %s3556_s1 = scalar_lea.vmem %s42_s26, 512  ;;  %p3561_p8 = scmp.lt.s32.totalorder %s42_s26, %s42_s26 }
  0x60   :  { %p3557_p7 = scmp.ne.s32.totalorder %s42_s26, %s3556_s1  ;;  %p3562_p9 = scmp.lt.s32.totalorder %s3556_s1, %s3556_s1 }
  0x62   :  { %p3563_p10 = por %p3562_p9, %p3561_p8 }
  0x64   :  { %p3564_p11 = pnand %p3563_p10, %p3557_p7 }
  0x66   :  { %3567 = shalt.err (!%p3564_p11)
}
  0x67   :  { %s4518_s7 = sld [smem:[#allocation36_spill]]  ;;  %s3756_s29 = smov [#allocation7]  }
  0x68   :  { %s69_s28 = sshll.u32 %s3756_s29, 4  ;;  %s3757_s5 = smov [#allocation10]   ;;  %s70_s28 = int_to_ptr.vmem [resolvable:$true] %s69_s28 }
  0x69   :  { %s91_s9 = sshll.u32 %s3757_s5, 4  ;;  %s3576_s19 = scalar_lea.vmem %s70_s28, 3072  ;;  %s92_s9 = int_to_ptr.vmem [resolvable:$true] %s91_s9 }
  0x6a   :  { %p3577_p12 = scmp.ne.s32.totalorder %s70_s28, %s3576_s19  ;;  %p3581_p13 = scmp.lt.s32.totalorder %s70_s28, %s70_s28 }
  0x6b   :  { %p3582_p0 = scmp.lt.s32.totalorder %s3576_s19, %s3576_s19 }
  0x6d   :  { %47 = dma.hbm_to_vmem [thread:$0]  %s4518_s7, 512, %s42_s26, [#allocation3], %s3748_s0, %s3748_s0, %s3749_s23  }
  0x6e   :  { %p3583_p1 = por %p3582_p0, %p3581_p13 }
  0x70   :  { %p3584_p2 = pnand %p3583_p1, %p3577_p12 }
  0x72   :  { %3587 = shalt.err (!%p3584_p2)
}
  0x73   :  { %s4519_s6 = sld [smem:[#allocation40_spill]]  ;;  %s3596_s30 = scalar_lea.vmem %s92_s9, 512 }
  0x74   :  { %p3597_p3 = scmp.ne.s32.totalorder %s92_s9, %s3596_s30  ;;  %p3601_p4 = scmp.lt.s32.totalorder %s92_s9, %s92_s9 }
  0x75   :  { %p3602_p5 = scmp.lt.s32.totalorder %s3596_s30, %s3596_s30 }
  0x77   :  { %p3603_p6 = por %p3602_p5, %p3601_p4 }
  0x79   :  { %75 = dma.hbm_to_vmem [thread:$0]  %s4519_s6, 3072, %s70_s28, [#allocation6], %s3748_s0, %s3748_s0, %s3749_s23  }
  0x7a   :  { %p3604_p7 = pnand %p3603_p6, %p3597_p3 }
  0x7c   :  { %3607 = shalt.err (!%p3604_p7)
}
  0x7d   :  { %s4520_s2 = sld [smem:[#allocation42_spill]]  ;;  %s3758_s11 = smov [#allocation13]  }
  0x7e   :  { %s113_s27 = sshll.u32 %s3758_s11, 4  ;;  %s3759_s3 = smov [#allocation16]   ;;  %s114_s27 = int_to_ptr.vmem [resolvable:$true] %s113_s27 }
  0x7f   :  { %s135_s1 = sshll.u32 %s3759_s3, 4  ;;  %s3616_s16 = scalar_lea.vmem %s114_s27, 3072  ;;  %s136_s1 = int_to_ptr.vmem [resolvable:$true] %s135_s1 }
  0x80   :  { %p3617_p8 = scmp.ne.s32.totalorder %s114_s27, %s3616_s16  ;;  %p3621_p9 = scmp.lt.s32.totalorder %s114_s27, %s114_s27 }
  0x81   :  { %p3622_p10 = scmp.lt.s32.totalorder %s3616_s16, %s3616_s16 }
  0x83   :  { %97 = dma.hbm_to_vmem [thread:$0]  %s4520_s2, 512, %s92_s9, [#allocation9], %s3748_s0, %s3748_s0, %s3749_s23  }
  0x84   :  { %p3623_p11 = por %p3622_p10, %p3621_p9 }
  0x86   :  { %p3624_p12 = pnand %p3623_p11, %p3617_p8 }
  0x88   :  { %3627 = shalt.err (!%p3624_p12)
}
  0x89   :  { %119 = dma.hbm_to_vmem [thread:$0]  %s4492_s8, 3072, %s114_s27, [#allocation12], %s3748_s0, %s3748_s0, %s3749_s23  }
  0x8a   :  { %s3636_s29 = scalar_lea.vmem %s136_s1, 6144  ;;  %p3641_p0 = scmp.lt.s32.totalorder %s136_s1, %s136_s1 }
  0x8b   :  { %p3637_p13 = scmp.ne.s32.totalorder %s136_s1, %s3636_s29  ;;  %p3642_p1 = scmp.lt.s32.totalorder %s3636_s29, %s3636_s29 }
  0x8d   :  { %p3643_p2 = por %p3642_p1, %p3641_p0 }
  0x8f   :  { %p3644_p3 = pnand %p3643_p2, %p3637_p13 }
  0x91   :  { %3647 = shalt.err (!%p3644_p3)
}
  0x92   :  { %141 = dma.hbm_to_vmem [thread:$0]  %s4494_s10, 6144, %s136_s1, [#allocation15], %s3748_s0, %s3748_s0, %s3749_s23  }
  0x93   :  { %s3760_s9 = smov [#allocation19]   ;;  %s3761_s22 = smov [#allocation22]  }
  0x94   :  { %s160_s19 = sshll.u32 %s3760_s9, 4  ;;  %s184_s24 = sshll.u32 %s3761_s22, 4  ;;  %s161_s19 = int_to_ptr.vmem [resolvable:$true] %s160_s19  ;;  %s185_s24 = int_to_ptr.vmem [resolvable:$true] %s184_s24 }
  0x95   :  { %s3656_s8 = scalar_lea.vmem %s161_s19, 16  ;;  %s3660_s6 = scalar_lea.vmem %s161_s19, 32 }
  0x96   :  { %p3657_p4 = scmp.ne.s32.totalorder %s161_s19, %s3656_s8  ;;  %p3661_p5 = scmp.lt.s32.totalorder %s161_s19, %s161_s19 }
  0x97   :  { %p3662_p6 = scmp.lt.s32.totalorder %s3660_s6, %s3656_s8 }
  0x99   :  { %p3663_p7 = por %p3662_p6, %p3661_p5 }
  0x9b   :  { %p3664_p8 = pnand %p3663_p7, %p3657_p4 }
  0x9d   :  { %3667 = shalt.err (!%p3664_p8)
}
  0x9e   :  { %163 = dma.hbm_to_vmem [thread:$0]  %s4497_s13, 16, %s161_s19, [#allocation18]  }
  0x9f   :  { %s3676_s26 = scalar_lea.vmem %s185_s24, 16  ;;  %s3680_s10 = scalar_lea.vmem %s185_s24, 32 }
  0xa0   :  { %p3677_p9 = scmp.ne.s32.totalorder %s185_s24, %s3676_s26  ;;  %p3681_p10 = scmp.lt.s32.totalorder %s185_s24, %s185_s24 }
  0xa1   :  { %p3682_p11 = scmp.lt.s32.totalorder %s3680_s10, %s3676_s26 }
  0xa3   :  { %p3683_p12 = por %p3682_p11, %p3681_p10 }
  0xa5   :  { %p3684_p13 = pnand %p3683_p12, %p3677_p9 }
  0xa7   :  { %3687 = shalt.err (!%p3684_p13)
}
  0xa8   :  { %187 = dma.hbm_to_vmem [thread:$0]  %s4501_s17, 16, %s185_s24, [#allocation21]  }
  0xa9   :  { %s3762_s27 = smov [#allocation25]  }
  0xaa   :  { %s205_s3 = sshll.u32 %s3762_s27, 4  ;;  %s206_s3 = int_to_ptr.vmem [resolvable:$true] %s205_s3 }
  0xab   :  { %s3696_s1 = scalar_lea.vmem %s206_s3, 2048  ;;  %p3701_p1 = scmp.lt.s32.totalorder %s206_s3, %s206_s3 }
  0xac   :  { %p3697_p0 = scmp.ne.s32.totalorder %s206_s3, %s3696_s1  ;;  %p3702_p2 = scmp.lt.s32.totalorder %s3696_s1, %s3696_s1 }
  0xae   :  { %p3703_p3 = por %p3702_p2, %p3701_p1 }
  0xb0   :  { %p3704_p4 = pnand %p3703_p3, %p3697_p0 }
  0xb2   :  { %3707 = shalt.err (!%p3704_p4)
}
  0xb3   :  { %211 = dma.hbm_to_vmem [thread:$0]  %s4504_s20, 2048, %s206_s3, [#allocation24], %s3748_s0, %s3748_s0, %s3749_s23  }
  0xb4   :  { %3728 = dma.done.wait [#allocation3], 512  }
  0xb5   :  { %3729 = vsyncadd [#allocation3], 4294966784 }
  0xb6   :  { %3730 = dma.done.wait [#allocation6], 4608  }
  0xb7   :  { %3731 = vsyncadd [#allocation6], 4294962688 }
  0xb8   :  { %3732 = dma.done.wait [#allocation9], 528  }
  0xb9   :  { %3733 = vsyncadd [#allocation9], 4294966768 }
  0xba   :  { %3734 = dma.done.wait [#allocation12], 3088  }
  0xbb   :  { %3735 = vsyncadd [#allocation12], 4294964208 }
  0xbc   :  { %3736 = dma.done.wait [#allocation15], 6160  }
  0xbd   :  { %3737 = vsyncadd [#allocation15], 4294961136 }
  0xbe   :  { %3738 = dma.done.wait [#allocation18], 32  }
  0xbf   :  { %3739 = vsyncadd [#allocation18], 4294967264 }
  0xc0   :  { %3740 = dma.done.wait [#allocation21], 32  }
  0xc1   :  { %3741 = vsyncadd [#allocation21], 4294967264 }
  0xc2   :  { %3742 = dma.done.wait [#allocation24], 2064  }
  0xc3   :  { %3743 = vsyncadd [#allocation24], 4294965232  ;;  %v3763_v0 = vmov 0   ;;  %s4521_s0 = sld [smem:[#allocation37_spill]]  ;;  %v270_v5 = vld [vmem:[#allocation10 + $0x18] sm:$0xff]  ;;  %v269_v8 = vld [vmem:[#allocation10 + $0x10] sm:$0xff] }
  0xc4   :  { %3401 = vset.pattern.permute.xlu1 %v3763_v0  ;;  %3400 = vset.pattern.permute.xlu0 %v3763_v0  ;;  %v466_v9 = vld [vmem:[#allocation5 + $0x38] sm:$0xff]  ;;  %v465_v10 = vld [vmem:[#allocation5 + $0x30] sm:$0xff]  ;;  %vm278_vm6 = vcmask 261120   ;;  %v267_v14 = vld [vmem:[#allocation10] sm:$0xff]  ;;  %vm421_vm13 = vcmask 1040384   ;;  %vm376_vm15 = vcmask 1041408  }
  0xc5   :  { %2905 = vmatprep.subr.mxu0 %v270_v5  ;;  %2919 = vmatprep.subr.mxu1 %v466_v9  ;;  %v268_v13 = vld [vmem:[#allocation10 + $0x8] sm:$0xff]  ;;  %v3978_v18 = vld [vmem:[#allocation2] sm:$0xff]  ;;  %v420_v20 = vld [vmem:[#allocation5 + $0x18] sm:$0xff]  ;;  %s4522_s22 = sld [smem:[#allocation39_spill]]  ;;  %s3766_s19 = smov [#allocation26]  }
  0xc6   :  { %2906 = vmatpush3.msra.mxu0 %v270_v5  ;;  %2920 = vmatpush3.msra.mxu1 %v466_v9  ;;  %v464_v15 = vld [vmem:[#allocation5 + $0x28] sm:$0xff]  ;;  %v463_v19 = vld [vmem:[#allocation5 + $0x20] sm:$0xff]  ;;  %v419_v24 = vld [vmem:[#allocation5 + $0x10] sm:$0xff]  ;;  %v422_v34 = vrot.slane %v3978_v18, 7  ;;  %v377_v40 = vrot.slane %v3978_v18, 6 }
  0xc7   :  { %2907 = vmatprep.subr.mxu0 %v269_v8  ;;  %2921 = vmatprep.subr.mxu1 %v465_v10  ;;  %v3986_v23 = vld [vmem:[#allocation2 + $0x8] sm:$0xff]  ;;  %v665_v25 = vld [vmem:[#allocation5 + $0x58] sm:$0xff]  ;;  %v3991_v26 = vld [vmem:[#allocation2 + $0x10] sm:$0xff] }
  0xc8   :  { %2908 = vmatpush3.msra.mxu0 %v269_v8  ;;  %2922 = vmatpush3.msra.mxu1 %v465_v10  ;;  %v3999_v29 = vld [vmem:[#allocation2 + $0x18] sm:$0xff]  ;;  %v418_v30 = vld [vmem:[#allocation5 + $0x8] sm:$0xff]  ;;  %v417_v33 = vld [vmem:[#allocation5] sm:$0xff]  ;;  %v433_v35 = vsel %vm421_vm13, 0.0, %v422_v34  ;;  %v423_v36 = vrot.slane %v3986_v23, 7  ;;  %v425_v37 = vrot.slane %v3991_v26, 7 }
  0xc9   :  { %v3953_v1 = vld [vmem:[%s4521_s0 + $0x10] sm:$0xff]  ;;  %v3958_v2 = vld [vmem:[%s4521_s0] sm:$0xff]  ;;  %v3963_v3 = vld [vmem:[%s4521_s0 + $0x18] sm:$0xff]  ;;  %2909 = vmatprep.subr.mxu0 %v268_v13  ;;  %2913 = vmatprep.mubr.msk.f32.mxu0 %vm278_vm6, %v3978_v18  ;;  %v427_v42 = vrot.slane %v3999_v29, 7  ;;  %v378_v43 = vrot.slane %v3986_v23, 6  ;;  %v388_v52 = vsel %vm376_vm15, 0.0, %v377_v40 }
  0xca   :  { %vm436_vm0 = vcmp.ge.s32.totalorder %v3953_v1, 1  ;;  %vm434_vm1 = vcmp.ge.s32.totalorder %v3958_v2, 1  ;;  %vm437_vm2 = vcmp.ge.s32.totalorder %v3963_v3, 1  ;;  %v260_v4 = vld [vmem:[%s4521_s0 + $0x8] sm:$0xff]  ;;  %vm389_vm5 = vcmp.ge.s32.totalorder %v3958_v2, 2  ;;  %2910 = vmatpush3.msra.mxu0 %v268_v13  ;;  %2923 = vmatprep.subr.mxu1 %v464_v15  ;;  %v664_v51 = vld [vmem:[#allocation5 + $0x50] sm:$0xff] }
  0xcb   :  { %v440_v6 = vsel %vm436_vm0, 1, %v3763_v0  ;;  %v438_v7 = vsel %vm434_vm1, 1, %v3763_v0  ;;  %vm435_vm3 = vcmp.ge.s32.totalorder %v260_v4, 1  ;;  %v441_v11 = vsel %vm437_vm2, 1, %v3763_v0  ;;  %2911 = vmatprep.subr.mxu0 %v267_v14  ;;  %2924 = vmatpush3.msra.mxu1 %v464_v15  ;;  %v663_v58 = vld [vmem:[#allocation5 + $0x48] sm:$0xff]  ;;  %v662_v62 = vld [vmem:[#allocation5 + $0x40] sm:$0xff] }
  0xcc   :  { %449 = vperm.xlu1 %3401, %v440_v6   ;;  %443 = vperm.xlu0 %3400, %v438_v7   ;;  %v439_v12 = vsel %vm435_vm3, 1, %v3763_v0  ;;  %vm390_vm4 = vcmp.ge.s32.totalorder %v260_v4, 2  ;;  %v393_v17 = vsel %vm389_vm5, 1, %v3763_v0  ;;  %vm392_vm7 = vcmp.ge.s32.totalorder %v3963_v3, 2  ;;  %v822_v5 = vld [vmem:[#allocation7 + $0x78] sm:$0xff]  ;;  %v821_v7 = vld [vmem:[#allocation7 + $0x70] sm:$0xff] }
  0xcd   :  { %v394_v16 = vsel %vm390_vm4, 1, %v3763_v0  ;;  %vm391_vm8 = vcmp.ge.s32.totalorder %v3953_v1, 2  ;;  %v396_v21 = vsel %vm392_vm7, 1, %v3763_v0  ;;  %2912 = vmatpush3.msra.mxu0 %v267_v14  ;;  %vm1273_vm9 = vcmp.ge.s32.totalorder %v260_v4, 4  ;;  %2925 = vmatprep.subr.mxu1 %v463_v19  ;;  %v797_v6 = vld [vmem:[#allocation7 + $0x38] sm:$0xff]  ;;  %v796_v8 = vld [vmem:[#allocation7 + $0x30] sm:$0xff] }
  0xce   :  { %v395_v22 = vsel %vm391_vm8, 1, %v3763_v0  ;;  %vm1272_vm10 = vcmp.ge.s32.totalorder %v3958_v2, 4  ;;  %2914 = vmatmul.mubr.msk.f32.vlgmr.msra.gmra.mxu0 %vm278_vm6, %v3986_v23  ;;  %2933 = vmatprep.subr.mxu0 %v420_v20  ;;  %v1277_v27 = vsel %vm1273_vm9, 1, %v3763_v0  ;;  %vm1275_vm11 = vcmp.ge.s32.totalorder %v3963_v3, 4  ;;  %v820_v9 = vld [vmem:[#allocation7 + $0x68] sm:$0xff]  ;;  %v818_v13 = vld [vmem:[#allocation7 + $0x58] sm:$0xff] }
  0xcf   :  { %2926 = vmatpush3.msra.mxu1 %v463_v19  ;;  %v1276_v28 = vsel %vm1272_vm10, 1, %v3763_v0  ;;  %2934 = vmatpush3.msra.mxu0 %v420_v20  ;;  %vm1274_vm12 = vcmp.ge.s32.totalorder %v3953_v1, 4  ;;  %v1279_v31 = vsel %vm1275_vm11, 1, %v3763_v0  ;;  %v424_v44 = vsel %vm421_vm13, %v422_v34, %v423_v36  ;;  %v795_v10 = vld [vmem:[#allocation7 + $0x28] sm:$0xff]  ;;  %v793_v14 = vld [vmem:[#allocation7 + $0x18] sm:$0xff]  ;;  %v817_v15 = vld [vmem:[#allocation7 + $0x50] sm:$0xff] }
  0xd0   :  { %452 = vperm.xlu1 %3401, %v441_v11   ;;  %446 = vperm.xlu0 %3400, %v439_v12   ;;  %v1278_v32 = vsel %vm1274_vm12, 1, %v3763_v0  ;;  %v426_v45 = vsel %vm421_vm13, %v423_v36, %v425_v37  ;;  %v428_v48 = vsel %vm421_vm13, %v425_v37, %v427_v42  ;;  %v379_v50 = vsel %vm376_vm15, %v377_v40, %v378_v43  ;;  %v819_v11 = vld [vmem:[#allocation7 + $0x60] sm:$0xff] }
  0xd1   :  { %2916 = vmatprep.mubr.msk.f32.mxu0 %vm278_vm6, %v3991_v26  ;;  %2935 = vmatprep.subr.mxu0 %v419_v24  ;;  %v380_v54 = vrot.slane %v3991_v26, 6  ;;  %v382_v55 = vrot.slane %v3999_v29, 6  ;;  %v794_v12 = vld [vmem:[#allocation7 + $0x20] sm:$0xff]  ;;  %vm1259_vm8 = vcmask 1043456  }
  0xd2   :  { %2947 = vmatprep.subr.mxu1 %v665_v25  ;;  %2917 = vmatmul.mubr.msk.f32.gmra.mxu0 %vm278_vm6, %v3999_v29  ;;  %v815_v19 = vld [vmem:[#allocation7 + $0x40] sm:$0xff] }
  0xd3   :  { %2936 = vmatpush3.msra.mxu0 %v419_v24  ;;  %v381_v63 = vsel %vm376_vm15, %v378_v43, %v380_v54  ;;  %v383_v0 = vsel %vm376_vm15, %v380_v54, %v382_v55  ;;  %v790_v20 = vld [vmem:[#allocation7] sm:$0xff] }
  0xd4   :  { %401 = vperm.xlu1 %3401, %v394_v16   ;;  %398 = vperm.xlu0 %3400, %v393_v17   ;;  %v792_v16 = vld [vmem:[#allocation7 + $0x10] sm:$0xff]  ;;  %v816_v17 = vld [vmem:[#allocation7 + $0x48] sm:$0xff]  ;;  %v2610_v34 = vld [vmem:[%s4522_s22] ss:$0 sm:$0xff]  ;;  %s2577_s22 = sshll.u32 %s3766_s19, 4  ;;  %s2578_s22 = int_to_ptr.vmem [resolvable:$true] %s2577_s22 }
  0xd5   :  { %2937 = vmatprep.subr.mxu0 %v418_v30  ;;  %s3708_s24 = scalar_lea.vmem %s2578_s22, 32  ;;  %p3713_p6 = scmp.lt.s32.totalorder %s2578_s22, %s2578_s22 }
  0xd6   :  { %2938 = vmatpush3.msra.mxu0 %v418_v30  ;;  %p3709_p5 = scmp.ne.s32.totalorder %s2578_s22, %s3708_s24  ;;  %p3714_p7 = scmp.lt.s32.totalorder %s3708_s24, %s3708_s24 }
  0xd7   :  { %2939 = vmatprep.subr.mxu0 %v417_v33 }
  0xd8   :  { %407 = vperm.xlu1 %3401, %v396_v21   ;;  %404 = vperm.xlu0 %3400, %v395_v22   ;;  %v1026_v21 = vld [vmem:[#allocation7 + $0xb8] sm:$0xff]  ;;  %p3715_p8 = por %p3714_p7, %p3713_p6 }
  0xd9   :  { %2940 = vmatpush3.msra.mxu0 %v417_v33 }
  0xda   :  { %2961 = vmatprep.subr.mxu0 %v822_v5  ;;  %p3716_p9 = pnand %p3715_p8, %p3709_p5 }
  0xdc   :  { %1284 = vperm.xlu1 %3401, %v1277_v27   ;;  %1281 = vperm.xlu0 %3400, %v1276_v28  }
  0xe0   :  { %1290 = vperm.xlu1 %3401, %v1279_v31   ;;  %1287 = vperm.xlu0 %3400, %v1278_v32  }
 0x147   :  { %v4009_v38 = vpop.permute.xlu1 %449  ;;  %v4011_v39 = vpop.permute.xlu0 %443 }
 0x148   :  { %vm454_vm14 = vcmp.eq.s32.totalorder %v4011_v39, 1  ;;  %vm456_vm0 = vcmp.eq.s32.totalorder %v4009_v38, 1  ;;  %v1022_v38 = vld [vmem:[#allocation7 + $0x98] sm:$0xff] }
 0x149   :  { %v458_v41 = vsel %vm454_vm14, %v433_v35, 0.0  ;;  %v460_v53 = vsel %vm456_vm0, %v426_v45, 0.0 }
 0x14a   :  { %2927 = vmatprep.mubr.msk.f32.mxu1 %vm278_vm6, %v458_v41 }
 0x14b   :  { %v4023_v46 = vpop.permute.xlu1 %452  ;;  %v4025_v47 = vpop.permute.xlu0 %446 }
 0x14c   :  { %vm455_vm1 = vcmp.eq.s32.totalorder %v4025_v47, 1  ;;  %vm457_vm2 = vcmp.eq.s32.totalorder %v4023_v46, 1  ;;  %v1021_v46 = vld [vmem:[#allocation7 + $0x90] sm:$0xff] }
 0x14d   :  { %v459_v49 = vsel %vm455_vm1, %v424_v44, 0.0  ;;  %v461_v59 = vsel %vm457_vm2, %v428_v48, 0.0 }
 0x14e   :  { %2928 = vmatmul.mubr.msk.f32.vlgmr.msra.gmra.mxu1 %vm278_vm6, %v459_v49 }
 0x14f   :  { %2948 = vmatpush3.msra.mxu1 %v665_v25  ;;  %v4039_v56 = vpop.permute.xlu1 %401  ;;  %2930 = vmatprep.mubr.msk.f32.mxu1 %vm278_vm6, %v460_v53  ;;  %v4042_v57 = vpop.permute.xlu0 %398 }
 0x150   :  { %vm410_vm3 = vcmp.eq.s32.totalorder %v4039_v56, 1  ;;  %2949 = vmatprep.subr.mxu1 %v664_v51  ;;  %vm409_vm4 = vcmp.eq.s32.totalorder %v4042_v57, 1 }
 0x151   :  { %v414_v60 = vsel %vm410_vm3, %v379_v50, 0.0  ;;  %2950 = vmatpush3.msra.mxu1 %v664_v51  ;;  %v413_v61 = vsel %vm409_vm4, %v388_v52, 0.0 }
 0x152   :  { %2951 = vmatprep.subr.mxu1 %v663_v58  ;;  %2931 = vmatmul.mubr.msk.f32.gmra.mxu1 %vm278_vm6, %v461_v59 }
 0x153   :  { %2941 = vmatprep.mubr.msk.f32.mxu0 %vm278_vm6, %v413_v61  ;;  %2952 = vmatpush3.msra.mxu1 %v663_v58  ;;  %v4056_v1 = vpop.permute.xlu1 %407  ;;  %v4058_v2 = vpop.permute.xlu0 %404 }
 0x154   :  { %vm412_vm5 = vcmp.eq.s32.totalorder %v4056_v1, 1  ;;  %2942 = vmatmul.mubr.msk.f32.vlgmr.msra.gmra.mxu0 %vm278_vm6, %v414_v60  ;;  %2953 = vmatprep.subr.mxu1 %v662_v62  ;;  %vm411_vm7 = vcmp.eq.s32.totalorder %v4058_v2, 1  ;;  %v1889_v2 = vld [vmem:[#allocation16 + $0x148] sm:$0xff]  ;;  %v1886_v1 = vld [vmem:[#allocation16 + $0x130] sm:$0xff] }
 0x155   :  { %2954 = vmatpush3.msra.mxu1 %v662_v62  ;;  %2955 = vmatprep.mubr.msk.f32.mxu1 %vm278_vm6, %v3978_v18  ;;  %v415_v3 = vsel %vm411_vm7, %v381_v63, 0.0  ;;  %v416_v4 = vsel %vm412_vm5, %v383_v0, 0.0  ;;  %v791_v18 = vld [vmem:[#allocation7 + $0x8] sm:$0xff] }
 0x156   :  { %2944 = vmatprep.mubr.msk.f32.mxu0 %vm278_vm6, %v415_v3  ;;  %2956 = vmatmul.mubr.msk.f32.vlgmr.msra.gmra.mxu1 %vm278_vm6, %v3986_v23 }
 0x157   :  { %2958 = vmatprep.mubr.msk.f32.mxu1 %vm278_vm6, %v3991_v26  ;;  %2962 = vmatpush3.msra.mxu0 %v822_v5 }
 0x158   :  { %2945 = vmatmul.mubr.msk.f32.gmra.mxu0 %vm278_vm6, %v416_v4  ;;  %2983 = vmatprep.subr.mxu1 %v797_v6 }
 0x159   :  { %2963 = vmatprep.subr.mxu0 %v821_v7  ;;  %2984 = vmatpush3.msra.mxu1 %v797_v6 }
 0x15a   :  { %2959 = vmatmul.mubr.msk.f32.gmra.mxu1 %vm278_vm6, %v3999_v29  ;;  %2964 = vmatpush3.msra.mxu0 %v821_v7  ;;  %vm823_vm6 = vcmask 523264  }
 0x15b   :  { %2985 = vmatprep.subr.mxu1 %v796_v8  ;;  %2965 = vmatprep.subr.mxu0 %v820_v9 }
 0x15c   :  { %2986 = vmatpush3.msra.mxu1 %v796_v8  ;;  %2966 = vmatpush3.msra.mxu0 %v820_v9 }
 0x15d   :  { %2987 = vmatprep.subr.mxu1 %v795_v10  ;;  %2967 = vmatprep.subr.mxu0 %v819_v11 }
 0x15e   :  { %2988 = vmatpush3.msra.mxu1 %v795_v10  ;;  %2968 = vmatpush3.msra.mxu0 %v819_v11  ;;  %v1025_v11 = vld [vmem:[#allocation7 + $0xb0] sm:$0xff] }
 0x15f   :  { %2989 = vmatprep.subr.mxu1 %v794_v12  ;;  %2969 = vmatprep.subr.mxu0 %v818_v13 }
 0x160   :  { %2990 = vmatpush3.msra.mxu1 %v794_v12  ;;  %2970 = vmatpush3.msra.mxu0 %v818_v13 }
 0x161   :  { %2991 = vmatprep.subr.mxu1 %v793_v14  ;;  %2971 = vmatprep.subr.mxu0 %v817_v15 }
 0x162   :  { %2992 = vmatpush3.msra.mxu1 %v793_v14  ;;  %2972 = vmatpush3.msra.mxu0 %v817_v15 }
 0x163   :  { %2993 = vmatprep.subr.mxu1 %v792_v16  ;;  %2973 = vmatprep.subr.mxu0 %v816_v17 }
 0x164   :  { %2994 = vmatpush3.msra.mxu1 %v792_v16  ;;  %2974 = vmatpush3.msra.mxu0 %v816_v17  ;;  %v1024_v16 = vld [vmem:[#allocation7 + $0xa8] sm:$0xff] }
 0x165   :  { %2995 = vmatprep.subr.mxu1 %v791_v18  ;;  %2975 = vmatprep.subr.mxu0 %v815_v19 }
 0x166   :  { %2996 = vmatpush3.msra.mxu1 %v791_v18  ;;  %2976 = vmatpush3.msra.mxu0 %v815_v19 }
 0x167   :  { %2997 = vmatprep.subr.mxu1 %v790_v20  ;;  %3005 = vmatprep.subr.mxu0 %v1026_v21 }
 0x168   :  { %2998 = vmatpush3.msra.mxu1 %v790_v20 }
 0x18e   :  { %v4077_v22 = vpop.f32.mrf.mxu0 }
 0x190   :  { %v4079_v23 = vpop.f32.mrf.mxu0 }
 0x192   :  { %v4081_v24 = vpop.f32.mrf.mxu0 }
 0x194   :  { %v4083_v26 = vpop.f32.mrf.mxu0 }
 0x20e   :  { %v2929_v25 = vpop.f32.mrf.mxu1 }
 0x210   :  { %v545_v27 = vpop.f32.mrf.mxu1 }
 0x212   :  { %v2932_v28 = vpop.f32.mrf.mxu1 }
 0x214   :  { %v2943_v29 = vpop.f32.mrf.mxu0  ;;  %v555_v30 = vpop.f32.mrf.mxu1 }
 0x215   :  { %v648_v31 = vadd.f32 %v2943_v29, %v2929_v25  ;;  %v1019_v29 = vld [vmem:[#allocation7 + $0x80] sm:$0xff] }
 0x216   :  { %v642_v32 = vpop.f32.mrf.mxu0  ;;  %v2957_v33 = vpop.f32.mrf.mxu1 }
 0x217   :  { %v643_v35 = vadd.f32 %v642_v32, %v545_v27  ;;  %v752_v36 = vadd.f32 %v2957_v33, %v648_v31  ;;  %v1023_v27 = vld [vmem:[#allocation7 + $0xa0] sm:$0xff]  ;;  %v1153_v31 = vld [vmem:[%s4496_s12 + $0x30] sm:$0xff]  ;;  %v1152_v32 = vld [vmem:[%s4496_s12 + $0x28] sm:$0xff] }
 0x218   :  { %v2946_v37 = vpop.f32.mrf.mxu0  ;;  %v732_v40 = vpop.f32.mrf.mxu1  ;;  %v1332_v33 = vld [vmem:[#allocation13 + $0x78] sm:$0xff] }
 0x219   :  { %v763_v41 = vadd.f32 %v2610_v34, %v752_v36  ;;  %v658_v42 = vadd.f32 %v2946_v37, %v2932_v28  ;;  %v751_v43 = vadd.f32 %v732_v40, %v643_v35  ;;  %v1020_v28 = vld [vmem:[#allocation7 + $0x88] sm:$0xff]  ;;  %v1331_v35 = vld [vmem:[#allocation13 + $0x70] sm:$0xff] }
 0x21a   :  { %v652_v44 = vpop.f32.mrf.mxu0  ;;  %v2960_v45 = vpop.f32.mrf.mxu1  ;;  %v1150_v36 = vld [vmem:[%s4496_s12 + $0x18] sm:$0xff]  ;;  %v1330_v37 = vld [vmem:[#allocation13 + $0x68] sm:$0xff] }
 0x21b   :  { %v762_v48 = vadd.f32 %v2610_v34, %v751_v43  ;;  %v653_v49 = vadd.f32 %v652_v44, %v555_v30  ;;  %v754_v50 = vadd.f32 %v2960_v45, %v658_v42  ;;  %v4088_v51 = vmax.f32 %v763_v41, 0.0  ;;  %v1154_v30 = vld [vmem:[%s4496_s12 + $0x38] sm:$0xff]  ;;  %v1149_v40 = vld [vmem:[%s4496_s12 + $0x10] sm:$0xff]  ;;  %v1329_v41 = vld [vmem:[#allocation13 + $0x60] sm:$0xff] }
 0x21c   :  { %v742_v52 = vpop.f32.mrf.mxu1  ;;  %3027 = vmatprep.subr.mxu1 %v1154_v30  ;;  %v1148_v42 = vld [vmem:[%s4496_s12 + $0x8] sm:$0xff]  ;;  %v1328_v43 = vld [vmem:[#allocation13 + $0x58] sm:$0xff]  ;;  %v1327_v45 = vld [vmem:[#allocation13 + $0x50] sm:$0xff] }
 0x21d   :  { %v766_v53 = vmax.f32 %v762_v48, 0.0  ;;  %v765_v54 = vadd.f32 %v2610_v34, %v754_v50  ;;  %v753_v55 = vadd.f32 %v742_v52, %v653_v49  ;;  %v799_v61 = vrot.slane %v4088_v51, 7  ;;  %v1147_v44 = vld [vmem:[%s4496_s12] sm:$0xff]  ;;  %v1326_v48 = vld [vmem:[#allocation13 + $0x48] sm:$0xff] }
 0x21e   :  { %v775_v63 = vrot.slane %v4088_v51, 6  ;;  %v1307_v49 = vld [vmem:[#allocation13 + $0x38] sm:$0xff]  ;;  %v1325_v50 = vld [vmem:[#allocation13 + $0x40] sm:$0xff] }
 0x21f   :  { %v769_v58 = vmax.f32 %v765_v54, 0.0  ;;  %v798_v59 = vrot.slane %v766_v53, 7  ;;  %v774_v60 = vrot.slane %v766_v53, 6  ;;  %v764_v62 = vadd.f32 %v2610_v34, %v753_v55  ;;  %v1151_v34 = vld [vmem:[%s4496_s12 + $0x20] sm:$0xff] }
 0x221   :  { %v809_v0 = vsel %vm421_vm13, 0.0, %v798_v59  ;;  %v785_v3 = vsel %vm376_vm15, 0.0, %v774_v60  ;;  %v768_v4 = vmax.f32 %v764_v62, 0.0  ;;  %v800_v7 = vsel %vm421_vm13, %v798_v59, %v799_v61 }
 0x222   :  { %v810_v5 = vsel %vm454_vm14, %v809_v0, 0.0  ;;  %v786_v6 = vsel %vm409_vm4, %v785_v3, 0.0  ;;  %v779_v8 = vrot.slane %v769_v58, 6  ;;  %v811_v9 = vsel %vm455_vm1, %v800_v7, 0.0  ;;  %v2593_v0 = vld [vmem:[#allocation11] ss:$0 sm:$0xff] }
 0x223   :  { %2977 = vmatprep.mubr.msk.f32.mxu0 %vm823_vm6, %v810_v5  ;;  %2999 = vmatprep.mubr.msk.f32.mxu1 %vm823_vm6, %v786_v6  ;;  %v776_v10 = vsel %vm376_vm15, %v774_v60, %v775_v63  ;;  %v803_v12 = vrot.slane %v769_v58, 7  ;;  %v777_v13 = vrot.slane %v768_v4, 6  ;;  %v801_v39 = vrot.slane %v768_v4, 7 }
 0x224   :  { %2978 = vmatmul.mubr.msk.f32.vlgmr.msra.gmra.mxu0 %vm823_vm6, %v811_v9  ;;  %v787_v14 = vsel %vm410_vm3, %v776_v10, 0.0  ;;  %v363_v10 = vadd.f32 %v4077_v22, %v2593_v0  ;;  %vm3765_vm14 = vmmov 0  }
 0x225   :  { %3000 = vmatmul.mubr.msk.f32.vlgmr.msra.gmra.mxu1 %vm823_vm6, %v787_v14  ;;  %3006 = vmatpush3.msra.mxu0 %v1026_v21  ;;  %v802_v15 = vsel %vm421_vm13, %v799_v61, %v801_v39  ;;  %v778_v47 = vsel %vm376_vm15, %v775_v63, %v777_v13  ;;  %v804_v17 = vsel %vm421_vm13, %v801_v39, %v803_v12  ;;  %v2623_v63 = vld [vmem:[#allocation8] ss:$0 sm:$0xff] }
 0x226   :  { %3007 = vmatprep.subr.mxu0 %v1025_v11  ;;  %v780_v18 = vsel %vm376_vm15, %v777_v13, %v779_v8  ;;  %v812_v19 = vsel %vm456_vm0, %v802_v15, 0.0  ;;  %v788_v20 = vsel %vm411_vm7, %v778_v47, 0.0  ;;  %v813_v21 = vsel %vm457_vm2, %v804_v17, 0.0  ;;  %3028 = vmatpush3.msra.mxu1 %v1154_v30  ;;  %v1306_v30 = vld [vmem:[#allocation13 + $0x30] sm:$0xff] }
 0x227   :  { %3008 = vmatpush3.msra.mxu0 %v1025_v11  ;;  %v789_v25 = vsel %vm412_vm5, %v780_v18, 0.0  ;;  %2980 = vmatprep.mubr.msk.f32.mxu0 %vm823_vm6, %v812_v19  ;;  %v358_v15 = vadd.f32 %v2593_v0, %v4079_v23  ;;  %vm2199_vm0 = vcmask 64512  }
 0x228   :  { %3002 = vmatprep.mubr.msk.f32.mxu1 %vm823_vm6, %v788_v20  ;;  %3009 = vmatprep.subr.mxu0 %v1024_v16  ;;  %v373_v20 = vadd.f32 %v4081_v24, %v2593_v0 }
 0x229   :  { %2981 = vmatmul.mubr.msk.f32.gmra.mxu0 %vm823_vm6, %v813_v21  ;;  %3003 = vmatmul.mubr.msk.f32.gmra.mxu1 %vm823_vm6, %v789_v25 }
 0x22a   :  { %3010 = vmatpush3.msra.mxu0 %v1024_v16  ;;  %3021 = vmatprep.mubr.msk.f32.mxu0 %vm823_vm6, %v766_v53 }
 0x22b   :  { %3011 = vmatprep.subr.mxu0 %v1023_v27  ;;  %3029 = vmatprep.subr.mxu1 %v1153_v31 }
 0x22c   :  { %3012 = vmatpush3.msra.mxu0 %v1023_v27  ;;  %3030 = vmatpush3.msra.mxu1 %v1153_v31 }
 0x22d   :  { %3013 = vmatprep.subr.mxu0 %v1022_v38  ;;  %3031 = vmatprep.subr.mxu1 %v1152_v32 }
 0x22e   :  { %3014 = vmatpush3.msra.mxu0 %v1022_v38  ;;  %3032 = vmatpush3.msra.mxu1 %v1152_v32 }
 0x22f   :  { %3015 = vmatprep.subr.mxu0 %v1021_v46  ;;  %3033 = vmatprep.subr.mxu1 %v1151_v34 }
 0x230   :  { %3016 = vmatpush3.msra.mxu0 %v1021_v46  ;;  %3034 = vmatpush3.msra.mxu1 %v1151_v34 }
 0x231   :  { %3017 = vmatprep.subr.mxu0 %v1020_v28  ;;  %3035 = vmatprep.subr.mxu1 %v1150_v36 }
 0x232   :  { %3018 = vmatpush3.msra.mxu0 %v1020_v28  ;;  %3036 = vmatpush3.msra.mxu1 %v1150_v36  ;;  %v368_v28 = vadd.f32 %v2593_v0, %v4083_v26  ;;  %v1531_v0 = vld [vmem:[#allocation13 + $0x98] sm:$0xff] }
 0x233   :  { %3019 = vmatprep.subr.mxu0 %v1019_v29  ;;  %3037 = vmatprep.subr.mxu1 %v1149_v40 }
 0x234   :  { %3020 = vmatpush3.msra.mxu0 %v1019_v29  ;;  %3038 = vmatpush3.msra.mxu1 %v1149_v40 }
 0x235   :  { %3022 = vmatmul.mubr.msk.f32.vlgmr.msra.gmra.mxu0 %vm823_vm6, %v4088_v51  ;;  %3049 = vmatprep.subr.mxu0 %v1332_v33  ;;  %v4153_v51 = vld [vmem:[#allocation13 + $0xb8] sm:$0xff] }
 0x236   :  { %3024 = vmatprep.mubr.msk.f32.mxu0 %vm823_vm6, %v768_v4  ;;  %3050 = vmatpush3.msra.mxu0 %v1332_v33 }
 0x237   :  { %3051 = vmatprep.subr.mxu0 %v1331_v35  ;;  %3039 = vmatprep.subr.mxu1 %v1148_v42 }
 0x238   :  { %3052 = vmatpush3.msra.mxu0 %v1331_v35  ;;  %3040 = vmatpush3.msra.mxu1 %v1148_v42  ;;  %v1305_v35 = vld [vmem:[#allocation13 + $0x28] sm:$0xff] }
 0x239   :  { %3025 = vmatmul.mubr.msk.f32.gmra.mxu0 %vm823_vm6, %v769_v58  ;;  %3053 = vmatprep.subr.mxu0 %v1330_v37 }
 0x23a   :  { %3054 = vmatpush3.msra.mxu0 %v1330_v37  ;;  %3041 = vmatprep.subr.mxu1 %v1147_v44  ;;  %v4176_v37 = vpop.permute.xlu0 %1281 }
 0x23b   :  { %3055 = vmatprep.subr.mxu0 %v1329_v41  ;;  %3042 = vmatpush3.msra.mxu1 %v1147_v44  ;;  %vm1292_vm9 = vcmp.eq.s32.totalorder %v4176_v37, 1 }
 0x23c   :  { %3056 = vmatpush3.msra.mxu0 %v1329_v41  ;;  %3071 = vmatprep.subr.mxu1 %v1307_v49 }
 0x23d   :  { %3057 = vmatprep.subr.mxu0 %v1328_v43 }
 0x23e   :  { %3058 = vmatpush3.msra.mxu0 %v1328_v43 }
 0x23f   :  { %3059 = vmatprep.subr.mxu0 %v1327_v45 }
 0x240   :  { %3060 = vmatpush3.msra.mxu0 %v1327_v45  ;;  %v1304_v45 = vld [vmem:[#allocation13 + $0x20] sm:$0xff] }
 0x241   :  { %3061 = vmatprep.subr.mxu0 %v1326_v48 }
 0x242   :  { %3062 = vmatpush3.msra.mxu0 %v1326_v48 }
 0x243   :  { %3063 = vmatprep.subr.mxu0 %v1325_v50 }
 0x244   :  { %3064 = vmatpush3.msra.mxu0 %v1325_v50  ;;  %v1534_v50 = vld [vmem:[#allocation13 + $0xb0] sm:$0xff] }
 0x245   :  { %3093 = vmatprep.subr.mxu0 %v4153_v51 }
 0x2e4   :  { %v2979_v52 = vpop.f32.mrf.mxu0 }
 0x2e5   :  { %v3001_v53 = vpop.f32.mrf.mxu1 }
 0x2e6   :  { %v902_v54 = vpop.f32.mrf.mxu0  ;;  %v1005_v61 = vadd.f32 %v3001_v53, %v2979_v52 }
 0x2e7   :  { %v999_v55 = vpop.f32.mrf.mxu1 }
 0x2e8   :  { %v1000_v3 = vadd.f32 %v999_v55, %v902_v54 }
 0x2e9   :  { %v2982_v58 = vpop.f32.mrf.mxu0  ;;  %v3004_v59 = vpop.f32.mrf.mxu1 }
 0x2ea   :  { %v1015_v7 = vadd.f32 %v3004_v59, %v2982_v58  ;;  %v1303_v58 = vld [vmem:[#allocation13 + $0x18] sm:$0xff]  ;;  %v1533_v59 = vld [vmem:[#allocation13 + $0xa8] sm:$0xff] }
 0x2eb   :  { %v912_v60 = vpop.f32.mrf.mxu0  ;;  %v1009_v5 = vpop.f32.mrf.mxu1 }
 0x2ec   :  { %v1010_v12 = vadd.f32 %v1009_v5, %v912_v60  ;;  %v1302_v60 = vld [vmem:[#allocation13 + $0x10] sm:$0xff] }
 0x2ed   :  { %v1530_v5 = vld [vmem:[#allocation13 + $0x90] sm:$0xff] }
 0x2f5   :  { %v3023_v62 = vpop.f32.mrf.mxu0 }
 0x2f6   :  { %v1121_v4 = vadd.f32 %v3023_v62, %v1005_v61  ;;  %v1532_v61 = vld [vmem:[#allocation13 + $0xa0] sm:$0xff]  ;;  %v4209_v62 = vpop.permute.xlu1 %1284 }
 0x2f7   :  { %v1101_v6 = vpop.f32.mrf.mxu0  ;;  %vm1293_vm10 = vcmp.eq.s32.totalorder %v4209_v62, 1 }
 0x2f8   :  { %v1132_v8 = vadd.f32 %v2623_v63, %v1121_v4  ;;  %v1120_v9 = vadd.f32 %v1101_v6, %v1000_v3  ;;  %v1300_v4 = vld [vmem:[#allocation13] sm:$0xff]  ;;  %v4214_v6 = vpop.permute.xlu0 %1287 }
 0x2f9   :  { %v3026_v11 = vpop.f32.mrf.mxu0  ;;  %vm1294_vm11 = vcmp.eq.s32.totalorder %v4214_v6, 1  ;;  %v1888_v6 = vld [vmem:[#allocation16 + $0x140] sm:$0xff] }
 0x2fa   :  { %v1136_v13 = vmax.f32 %v1132_v8, 0.0  ;;  %v1131_v39 = vadd.f32 %v2623_v63, %v1120_v9  ;;  %v1123_v14 = vadd.f32 %v3026_v11, %v1015_v7  ;;  %v1529_v7 = vld [vmem:[#allocation13 + $0x88] sm:$0xff] }
 0x2fb   :  { %v1111_v47 = vpop.f32.mrf.mxu0 }
 0x2fc   :  { %v1140_v16 = vadd.f32 %v1136_v13, %v363_v10  ;;  %v1135_v17 = vmax.f32 %v1131_v39, 0.0  ;;  %v1134_v18 = vadd.f32 %v2623_v63, %v1123_v14  ;;  %v1122_v19 = vadd.f32 %v1111_v47, %v1010_v12  ;;  %v4221_v10 = vpop.permute.xlu1 %1290  ;;  %v1528_v12 = vld [vmem:[#allocation13 + $0x80] sm:$0xff] }
 0x2fd   :  { %v1708_v13 = vld [vmem:[#allocation16 + $0xf8] sm:$0xff]  ;;  %vm1295_vm12 = vcmp.eq.s32.totalorder %v4221_v10, 1  ;;  %v1885_v10 = vld [vmem:[#allocation16 + $0x128] sm:$0xff] }
 0x2fe   :  { %v4159_v21 = vmax.f32 %v1140_v16, 0.0  ;;  %v1139_v25 = vadd.f32 %v1135_v17, %v358_v15  ;;  %v1138_v27 = vmax.f32 %v1134_v18, 0.0  ;;  %v1133_v38 = vadd.f32 %v2623_v63, %v1122_v19  ;;  %v1301_v63 = vld [vmem:[#allocation13 + $0x8] sm:$0xff]  ;;  %v1675_v47 = vld [vmem:[#allocation16 + $0x78] sm:$0xff]  ;;  %v1707_v16 = vld [vmem:[#allocation16 + $0xf0] sm:$0xff] }
 0x2ff   :  { %v1674_v17 = vld [vmem:[#allocation16 + $0x70] sm:$0xff]  ;;  %v1706_v18 = vld [vmem:[#allocation16 + $0xe8] sm:$0xff] }
 0x300   :  { %v4161_v22 = vmax.f32 %v1139_v25, 0.0  ;;  %v1142_v46 = vadd.f32 %v1138_v27, %v373_v20  ;;  %v1137_v29 = vmax.f32 %v1133_v38, 0.0  ;;  %v1309_v23 = vrot.slane %v4159_v21, 6  ;;  %v1673_v19 = vld [vmem:[#allocation16 + $0x68] sm:$0xff]  ;;  %v1705_v20 = vld [vmem:[#allocation16 + $0xe0] sm:$0xff]  ;;  %v1704_v25 = vld [vmem:[#allocation16 + $0xd8] sm:$0xff] }
 0x301   :  { %v1261_v26 = vrot.slane %v4159_v21, 4  ;;  %v1671_v27 = vld [vmem:[#allocation16 + $0x58] sm:$0xff]  ;;  %v1703_v38 = vld [vmem:[#allocation16 + $0xd0] sm:$0xff] }
 0x302   :  { %3043 = vmatprep.mubr.msk.f32.mxu1 %vm823_vm6, %v4161_v22  ;;  %v1308_v31 = vrot.slane %v4161_v22, 6  ;;  %v1260_v24 = vrot.slane %v4161_v22, 4  ;;  %v4169_v32 = vmax.f32 %v1142_v46, 0.0  ;;  %v1141_v33 = vadd.f32 %v1137_v29, %v368_v28  ;;  %v1702_v46 = vld [vmem:[#allocation16 + $0xc8] sm:$0xff]  ;;  %v1701_v29 = vld [vmem:[#allocation16 + $0xc0] sm:$0xff] }
 0x303   :  { %3044 = vmatmul.mubr.msk.f32.vlgmr.msra.gmra.mxu1 %vm823_vm6, %v4159_v21  ;;  %v1669_v28 = vld [vmem:[#allocation16 + $0x48] sm:$0xff] }
 0x304   :  { %3072 = vmatpush3.msra.mxu1 %v1307_v49  ;;  %v1319_v34 = vsel %vm376_vm15, 0.0, %v1308_v31  ;;  %v1310_v36 = vsel %vm376_vm15, %v1308_v31, %v1309_v23  ;;  %v4178_v40 = vmax.f32 %v1141_v33, 0.0  ;;  %v1271_v43 = vsel %vm1259_vm8, 0.0, %v1260_v24  ;;  %v1667_v31 = vld [vmem:[#allocation16 + $0x38] sm:$0xff]  ;;  %v1698_v33 = vld [vmem:[#allocation16 + $0xa8] sm:$0xff] }
 0x305   :  { %3073 = vmatprep.subr.mxu1 %v1306_v30  ;;  %v1320_v41 = vsel %vm409_vm4, %v1319_v34, 0.0  ;;  %v1321_v42 = vsel %vm410_vm3, %v1310_v36, 0.0  ;;  %v1262_v44 = vsel %vm1259_vm8, %v1260_v24, %v1261_v26  ;;  %v1313_v49 = vrot.slane %v4169_v32, 6  ;;  %v1699_v24 = vld [vmem:[#allocation16 + $0xb0] sm:$0xff]  ;;  %v1697_v34 = vld [vmem:[#allocation16 + $0xa0] sm:$0xff]  ;;  %v1696_v36 = vld [vmem:[#allocation16 + $0x98] sm:$0xff] }
 0x306   :  { %3074 = vmatpush3.msra.mxu1 %v1306_v30  ;;  %3065 = vmatprep.mubr.msk.f32.mxu0 %vm823_vm6, %v1320_v41  ;;  %v1311_v48 = vrot.slane %v4178_v40, 6  ;;  %v1296_v52 = vsel %vm1292_vm9, %v1271_v43, 0.0  ;;  %v1263_v3 = vrot.slane %v4178_v40, 4  ;;  %v1265_v9 = vrot.slane %v4169_v32, 4  ;;  %v1700_v30 = vld [vmem:[#allocation16 + $0xb8] sm:$0xff]  ;;  %v1695_v41 = vld [vmem:[#allocation16 + $0x90] sm:$0xff] }
 0x307   :  { %3046 = vmatprep.mubr.msk.f32.mxu1 %vm823_vm6, %v4178_v40  ;;  %3075 = vmatprep.subr.mxu1 %v1305_v35  ;;  %v1297_v11 = vsel %vm1293_vm10, %v1262_v44, 0.0  ;;  %v1694_v43 = vld [vmem:[#allocation16 + $0x88] sm:$0xff] }
 0x308   :  { %3047 = vmatmul.mubr.msk.f32.gmra.mxu1 %vm823_vm6, %v4169_v32  ;;  %3066 = vmatmul.mubr.msk.f32.vlgmr.msra.gmra.mxu0 %vm823_vm6, %v1321_v42  ;;  %v1312_v53 = vsel %vm376_vm15, %v1309_v23, %v1311_v48  ;;  %v1314_v54 = vsel %vm376_vm15, %v1311_v48, %v1313_v49  ;;  %v1264_v8 = vsel %vm1259_vm8, %v1261_v26, %v1263_v3  ;;  %v1668_v23 = vld [vmem:[#allocation16 + $0x40] sm:$0xff]  ;;  %v1665_v26 = vld [vmem:[#allocation16 + $0x28] sm:$0xff]  ;;  %v1662_v42 = vld [vmem:[#allocation16 + $0x10] sm:$0xff] }
 0x309   :  { %3076 = vmatpush3.msra.mxu1 %v1305_v35  ;;  %3094 = vmatpush3.msra.mxu0 %v4153_v51  ;;  %v1322_v55 = vsel %vm411_vm7, %v1312_v53, 0.0  ;;  %v1323_v51 = vsel %vm412_vm5, %v1314_v54, 0.0  ;;  %v1298_v39 = vsel %vm1294_vm11, %v1264_v8, 0.0  ;;  %v1266_v14 = vsel %vm1259_vm8, %v1263_v3, %v1265_v9  ;;  %v1664_v35 = vld [vmem:[#allocation16 + $0x20] sm:$0xff]  ;;  %v1661_v44 = vld [vmem:[#allocation16 + $0x8] sm:$0xff]  ;;  %v1895_v49 = vld [vmem:[#allocation16 + $0x178] sm:$0xff] }
 0x30a   :  { %3077 = vmatprep.subr.mxu1 %v1304_v45  ;;  %3087 = vmatprep.mubr.msk.f32.mxu1 %vm823_vm6, %v1296_v52  ;;  %v1299_v15 = vsel %vm1295_vm12, %v1266_v14, 0.0  ;;  %v1660_v48 = vld [vmem:[#allocation16] sm:$0xff] }
 0x30b   :  { %3095 = vmatprep.subr.mxu0 %v1534_v50  ;;  %3078 = vmatpush3.msra.mxu1 %v1304_v45  ;;  %v1693_v45 = vld [vmem:[#allocation16 + $0x80] sm:$0xff] }
 0x30c   :  { %3096 = vmatpush3.msra.mxu0 %v1534_v50  ;;  %3068 = vmatprep.mubr.msk.f32.mxu0 %vm823_vm6, %v1322_v55 }
 0x30d   :  { %3079 = vmatprep.subr.mxu1 %v1303_v58  ;;  %3097 = vmatprep.subr.mxu0 %v1533_v59 }
 0x30e   :  { %3069 = vmatmul.mubr.msk.f32.gmra.mxu0 %vm823_vm6, %v1323_v51  ;;  %3080 = vmatpush3.msra.mxu1 %v1303_v58 }
 0x30f   :  { %3098 = vmatpush3.msra.mxu0 %v1533_v59  ;;  %3081 = vmatprep.subr.mxu1 %v1302_v60 }
 0x310   :  { %3099 = vmatprep.subr.mxu0 %v1532_v61  ;;  %3109 = vmatprep.mubr.msk.f32.mxu0 %vm823_vm6, %v4161_v22  ;;  %v1670_v22 = vld [vmem:[#allocation16 + $0x50] sm:$0xff] }
 0x311   :  { %3082 = vmatpush3.msra.mxu1 %v1302_v60  ;;  %3100 = vmatpush3.msra.mxu0 %v1532_v61 }
 0x312   :  { %3083 = vmatprep.subr.mxu1 %v1301_v63  ;;  %3101 = vmatprep.subr.mxu0 %v1531_v0 }
 0x313   :  { %3084 = vmatpush3.msra.mxu1 %v1301_v63  ;;  %3102 = vmatpush3.msra.mxu0 %v1531_v0 }
 0x314   :  { %3085 = vmatprep.subr.mxu1 %v1300_v4  ;;  %3103 = vmatprep.subr.mxu0 %v1530_v5 }
 0x315   :  { %3086 = vmatpush3.msra.mxu1 %v1300_v4  ;;  %3104 = vmatpush3.msra.mxu0 %v1530_v5  ;;  %v2641_v4 = vld [vmem:[#allocation14] ss:$0 sm:$0xff] }
 0x316   :  { %3088 = vmatmul.mubr.msk.f32.vlgmr.msra.gmra.mxu1 %vm823_vm6, %v1297_v11  ;;  %3105 = vmatprep.subr.mxu0 %v1529_v7 }
 0x317   :  { %3090 = vmatprep.mubr.msk.f32.mxu1 %vm823_vm6, %v1298_v39  ;;  %3106 = vmatpush3.msra.mxu0 %v1529_v7 }
 0x318   :  { %3107 = vmatprep.subr.mxu0 %v1528_v12  ;;  %3115 = vmatprep.subr.mxu1 %v1708_v13 }
 0x319   :  { %3108 = vmatpush3.msra.mxu0 %v1528_v12  ;;  %3116 = vmatpush3.msra.mxu1 %v1708_v13 }
 0x31a   :  { %3091 = vmatmul.mubr.msk.f32.gmra.mxu1 %vm823_vm6, %v1299_v15  ;;  %3110 = vmatmul.mubr.msk.f32.vlgmr.msra.gmra.mxu0 %vm823_vm6, %v4159_v21  ;;  %v1672_v21 = vld [vmem:[#allocation16 + $0x60] sm:$0xff] }
 0x31b   :  { %3112 = vmatprep.mubr.msk.f32.mxu0 %vm823_vm6, %v4178_v40  ;;  %3153 = vmatprep.subr.mxu0 %v1675_v47  ;;  %v1663_v40 = vld [vmem:[#allocation16 + $0x18] sm:$0xff] }
 0x31c   :  { %3117 = vmatprep.subr.mxu1 %v1707_v16  ;;  %3154 = vmatpush3.msra.mxu0 %v1675_v47 }
 0x31d   :  { %3118 = vmatpush3.msra.mxu1 %v1707_v16  ;;  %3155 = vmatprep.subr.mxu0 %v1674_v17 }
 0x31e   :  { %3113 = vmatmul.mubr.msk.f32.gmra.mxu0 %vm823_vm6, %v4169_v32  ;;  %3119 = vmatprep.subr.mxu1 %v1706_v18  ;;  %v1666_v32 = vld [vmem:[#allocation16 + $0x30] sm:$0xff] }
 0x31f   :  { %3156 = vmatpush3.msra.mxu0 %v1674_v17  ;;  %3120 = vmatpush3.msra.mxu1 %v1706_v18 }
 0x320   :  { %3157 = vmatprep.subr.mxu0 %v1673_v19  ;;  %3121 = vmatprep.subr.mxu1 %v1705_v20 }
 0x321   :  { %3158 = vmatpush3.msra.mxu0 %v1673_v19  ;;  %3122 = vmatpush3.msra.mxu1 %v1705_v20 }
 0x322   :  { %3159 = vmatprep.subr.mxu0 %v1672_v21  ;;  %3123 = vmatprep.subr.mxu1 %v1704_v25 }
 0x323   :  { %3160 = vmatpush3.msra.mxu0 %v1672_v21  ;;  %3124 = vmatpush3.msra.mxu1 %v1704_v25 }
 0x324   :  { %3161 = vmatprep.subr.mxu0 %v1671_v27  ;;  %3125 = vmatprep.subr.mxu1 %v1703_v38 }
 0x325   :  { %3162 = vmatpush3.msra.mxu0 %v1671_v27  ;;  %3126 = vmatpush3.msra.mxu1 %v1703_v38 }
 0x326   :  { %3163 = vmatprep.subr.mxu0 %v1670_v22  ;;  %3127 = vmatprep.subr.mxu1 %v1702_v46 }
 0x327   :  { %3164 = vmatpush3.msra.mxu0 %v1670_v22  ;;  %3128 = vmatpush3.msra.mxu1 %v1702_v46 }
 0x328   :  { %3165 = vmatprep.subr.mxu0 %v1669_v28  ;;  %3129 = vmatprep.subr.mxu1 %v1701_v29 }
 0x329   :  { %3166 = vmatpush3.msra.mxu0 %v1669_v28  ;;  %3130 = vmatpush3.msra.mxu1 %v1701_v29 }
 0x32a   :  { %3167 = vmatprep.subr.mxu0 %v1668_v23  ;;  %3131 = vmatprep.subr.mxu1 %v1700_v30 }
 0x32b   :  { %3168 = vmatpush3.msra.mxu0 %v1668_v23  ;;  %3132 = vmatpush3.msra.mxu1 %v1700_v30 }
 0x32c   :  { %3169 = vmatprep.subr.mxu0 %v1667_v31  ;;  %3133 = vmatprep.subr.mxu1 %v1699_v24 }
 0x32d   :  { %3170 = vmatpush3.msra.mxu0 %v1667_v31  ;;  %3134 = vmatpush3.msra.mxu1 %v1699_v24  ;;  %v1894_v24 = vld [vmem:[#allocation16 + $0x170] sm:$0xff] }
 0x32e   :  { %3171 = vmatprep.subr.mxu0 %v1666_v32  ;;  %3135 = vmatprep.subr.mxu1 %v1698_v33 }
 0x32f   :  { %3172 = vmatpush3.msra.mxu0 %v1666_v32  ;;  %3136 = vmatpush3.msra.mxu1 %v1698_v33 }
 0x330   :  { %3173 = vmatprep.subr.mxu0 %v1665_v26  ;;  %3137 = vmatprep.subr.mxu1 %v1697_v34 }
 0x331   :  { %3174 = vmatpush3.msra.mxu0 %v1665_v26  ;;  %3138 = vmatpush3.msra.mxu1 %v1697_v34  ;;  %v1893_v26 = vld [vmem:[#allocation16 + $0x168] sm:$0xff] }
 0x332   :  { %3175 = vmatprep.subr.mxu0 %v1664_v35  ;;  %3139 = vmatprep.subr.mxu1 %v1696_v36 }
 0x333   :  { %3176 = vmatpush3.msra.mxu0 %v1664_v35  ;;  %3140 = vmatpush3.msra.mxu1 %v1696_v36  ;;  %v1892_v36 = vld [vmem:[#allocation16 + $0x160] sm:$0xff] }
 0x334   :  { %3177 = vmatprep.subr.mxu0 %v1663_v40  ;;  %3141 = vmatprep.subr.mxu1 %v1695_v41 }
 0x335   :  { %3178 = vmatpush3.msra.mxu0 %v1663_v40  ;;  %3142 = vmatpush3.msra.mxu1 %v1695_v41  ;;  %v1891_v40 = vld [vmem:[#allocation16 + $0x158] sm:$0xff]  ;;  %v1890_v41 = vld [vmem:[#allocation16 + $0x150] sm:$0xff] }
 0x336   :  { %3179 = vmatprep.subr.mxu0 %v1662_v42  ;;  %3143 = vmatprep.subr.mxu1 %v1694_v43 }
 0x337   :  { %3180 = vmatpush3.msra.mxu0 %v1662_v42  ;;  %3144 = vmatpush3.msra.mxu1 %v1694_v43  ;;  %v1887_v42 = vld [vmem:[#allocation16 + $0x138] sm:$0xff]  ;;  %v1884_v43 = vld [vmem:[#allocation16 + $0x120] sm:$0xff] }
 0x338   :  { %3181 = vmatprep.subr.mxu0 %v1661_v44  ;;  %3145 = vmatprep.subr.mxu1 %v1693_v45 }
 0x339   :  { %3182 = vmatpush3.msra.mxu0 %v1661_v44  ;;  %3146 = vmatpush3.msra.mxu1 %v1693_v45  ;;  %v1883_v44 = vld [vmem:[#allocation16 + $0x118] sm:$0xff]  ;;  %v1882_v45 = vld [vmem:[#allocation16 + $0x110] sm:$0xff] }
 0x33a   :  { %3183 = vmatprep.subr.mxu0 %v1660_v48  ;;  %3191 = vmatprep.subr.mxu1 %v1895_v49 }
 0x33b   :  { %3184 = vmatpush3.msra.mxu0 %v1660_v48  ;;  %v1881_v48 = vld [vmem:[#allocation16 + $0x108] sm:$0xff] }
 0x3c3   :  { %v4241_v50 = vpop.f32.mrf.mxu1 }
 0x3c5   :  { %v4243_v52 = vpop.f32.mrf.mxu1 }
 0x3c8   :  { %v3067_v53 = vpop.f32.mrf.mxu0  ;;  %v4245_v54 = vpop.f32.mrf.mxu1 }
 0x3ca   :  { %v1411_v55 = vpop.f32.mrf.mxu0  ;;  %v4247_v58 = vpop.f32.mrf.mxu1 }
 0x3ce   :  { %v3070_v59 = vpop.f32.mrf.mxu0 }
 0x3d0   :  { %v1421_v60 = vpop.f32.mrf.mxu0 }
 0x3d6   :  { %v3089_v51 = vpop.f32.mrf.mxu1 }
 0x3d7   :  { %v1514_v63 = vadd.f32 %v3089_v51, %v3067_v53  ;;  %v3764_v53 = vmov 0.0   ;;  %v2053_v51 = vld [vmem:[%s4498_s14 + $0x68] sm:$0xff] }
 0x3d8   :  { %v1508_v61 = vpop.f32.mrf.mxu1  ;;  %3229 = vmatprep.subr.mxu0 %v3764_v53 }
 0x3d9   :  { %v1509_v5 = vadd.f32 %v1508_v61, %v1411_v55  ;;  %v2055_v55 = vld [vmem:[%s4498_s14 + $0x78] sm:$0xff] }
 0x3da   :  { %v3092_v0 = vpop.f32.mrf.mxu1  ;;  %v3111_v3 = vpop.f32.mrf.mxu0  ;;  %v2051_v61 = vld [vmem:[%s4498_s14 + $0x58] sm:$0xff] }
 0x3db   :  { %v1622_v7 = vadd.f32 %v3111_v3, %v1514_v63  ;;  %v1524_v9 = vadd.f32 %v3092_v0, %v3070_v59  ;;  %v2054_v59 = vld [vmem:[%s4498_s14 + $0x70] sm:$0xff]  ;;  %v2049_v0 = vld [vmem:[%s4498_s14 + $0x48] sm:$0xff]  ;;  %v2048_v3 = vld [vmem:[%s4498_s14 + $0x40] sm:$0xff] }
 0x3dc   :  { %v1602_v8 = vpop.f32.mrf.mxu0  ;;  %v1518_v12 = vpop.f32.mrf.mxu1  ;;  %v2050_v63 = vld [vmem:[%s4498_s14 + $0x50] sm:$0xff] }
 0x3dd   :  { %v1633_v11 = vadd.f32 %v2641_v4, %v1622_v7  ;;  %v1621_v13 = vadd.f32 %v1602_v8, %v1509_v5  ;;  %v1519_v16 = vadd.f32 %v1518_v12, %v1421_v60  ;;  %v2052_v60 = vld [vmem:[%s4498_s14 + $0x60] sm:$0xff]  ;;  %v2046_v5 = vld [vmem:[%s4498_s14 + $0x30] sm:$0xff]  ;;  %v2045_v7 = vld [vmem:[%s4498_s14 + $0x28] sm:$0xff] }
 0x3de   :  { %v3114_v39 = vpop.f32.mrf.mxu0  ;;  %v2044_v8 = vld [vmem:[%s4498_s14 + $0x20] sm:$0xff]  ;;  %v2041_v12 = vld [vmem:[%s4498_s14 + $0x8] sm:$0xff] }
 0x3df   :  { %v1632_v14 = vadd.f32 %v2641_v4, %v1621_v13  ;;  %v1624_v15 = vadd.f32 %v3114_v39, %v1524_v9  ;;  %v4249_v47 = vmax.f32 %v1633_v11, 0.0  ;;  %v2043_v9 = vld [vmem:[%s4498_s14 + $0x18] sm:$0xff]  ;;  %v2042_v11 = vld [vmem:[%s4498_s14 + $0x10] sm:$0xff]  ;;  %v2040_v13 = vld [vmem:[%s4498_s14] sm:$0xff] }
 0x3e0   :  { %v1612_v17 = vpop.f32.mrf.mxu0 }
 0x3e1   :  { %v1636_v18 = vmax.f32 %v1632_v14, 0.0  ;;  %v1635_v19 = vadd.f32 %v2641_v4, %v1624_v15  ;;  %v1623_v20 = vadd.f32 %v1612_v17, %v1519_v16  ;;  %v1645_v27 = vrot.slane %v4249_v47, 4 }
 0x3e2   :  { %v1677_v38 = vrot.slane %v4249_v47, 6 }
 0x3e3   :  { %v1676_v21 = vrot.slane %v1636_v18, 6  ;;  %v1644_v25 = vrot.slane %v1636_v18, 4  ;;  %v4253_v22 = vmax.f32 %v1635_v19, 0.0  ;;  %v1634_v46 = vadd.f32 %v2641_v4, %v1623_v20  ;;  %v2047_v4 = vld [vmem:[%s4498_s14 + $0x38] sm:$0xff] }
 0x3e5   :  { %v1687_v28 = vsel %vm376_vm15, 0.0, %v1676_v21  ;;  %v1655_v29 = vsel %vm1259_vm8, 0.0, %v1644_v25  ;;  %v4257_v23 = vmax.f32 %v1634_v46, 0.0  ;;  %v1678_v30 = vsel %vm376_vm15, %v1676_v21, %v1677_v38  ;;  %v2650_v21 = vld [vmem:[#allocation17] ss:$0 sm:$0xff] }
 0x3e6   :  { %3147 = vmatprep.mubr.msk.f32.mxu1 %vm409_vm4, %v1687_v28  ;;  %3185 = vmatprep.mubr.msk.f32.mxu0 %vm1292_vm9, %v1655_v29  ;;  %v1646_v31 = vsel %vm1259_vm8, %v1644_v25, %v1645_v27  ;;  %v1649_v32 = vrot.slane %v4253_v22, 4  ;;  %v1681_v33 = vrot.slane %v4253_v22, 6  ;;  %v2624_v25 = vld [vmem:[#allocation19] ss:$0 sm:$0xff] }
 0x3e7   :  { %3148 = vmatmul.mubr.msk.f32.vlgmr.msra.gmra.mxu1 %vm410_vm3, %v1678_v30  ;;  %3186 = vmatmul.mubr.msk.f32.vlgmr.msra.gmra.mxu0 %vm1293_vm10, %v1646_v31  ;;  %v1647_v57 = vrot.slane %v4257_v23, 4  ;;  %v1679_v37 = vrot.slane %v4257_v23, 6  ;;  %v1246_v30 = vadd.f32 %v4241_v50, %v2624_v25 }
 0x3e8   :  { %3192 = vmatpush3.msra.mxu1 %v1895_v49  ;;  %v1880_v49 = vld [vmem:[#allocation16 + $0x100] sm:$0xff]  ;;  %3230 = vmatpush3.msra.mxu0 %v2055_v55 }
 0x3e9   :  { %3193 = vmatprep.subr.mxu1 %v1894_v24  ;;  %v1680_v34 = vsel %vm376_vm15, %v1677_v38, %v1679_v37  ;;  %v1648_v56 = vsel %vm1259_vm8, %v1645_v27, %v1647_v57  ;;  %v1682_v35 = vsel %vm376_vm15, %v1679_v37, %v1681_v33  ;;  %v1650_v62 = vsel %vm1259_vm8, %v1647_v57, %v1649_v32 }
 0x3ea   :  { %3194 = vmatpush3.msra.mxu1 %v1894_v24  ;;  %3150 = vmatprep.mubr.msk.f32.mxu1 %vm411_vm7, %v1680_v34  ;;  %v1241_v37 = vadd.f32 %v2624_v25, %v4243_v52 }
 0x3eb   :  { %3188 = vmatprep.mubr.msk.f32.mxu0 %vm1294_vm11, %v1648_v56  ;;  %3195 = vmatprep.subr.mxu1 %v1893_v26 }
 0x3ec   :  { %3151 = vmatmul.mubr.msk.f32.gmra.mxu1 %vm412_vm5, %v1682_v35  ;;  %3189 = vmatmul.mubr.msk.f32.gmra.mxu0 %vm1295_vm12, %v1650_v62 }
 0x3ed   :  { %3196 = vmatpush3.msra.mxu1 %v1893_v26  ;;  %3223 = vmatprep.mubr.f32.mxu1 %v1636_v18 }
 0x3ee   :  { %3197 = vmatprep.subr.mxu1 %v1892_v36  ;;  %3231 = vmatprep.subr.mxu0 %v3764_v53 }
 0x3ef   :  { %3198 = vmatpush3.msra.mxu1 %v1892_v36  ;;  %3232 = vmatpush3.msra.mxu0 %v2054_v59  ;;  %v1256_v36 = vadd.f32 %v4245_v54, %v2624_v25 }
 0x3f0   :  { %3199 = vmatprep.subr.mxu1 %v1891_v40  ;;  %3233 = vmatprep.subr.mxu0 %v3764_v53 }
 0x3f1   :  { %3200 = vmatpush3.msra.mxu1 %v1891_v40  ;;  %3234 = vmatpush3.msra.mxu0 %v2053_v51 }
 0x3f2   :  { %3201 = vmatprep.subr.mxu1 %v1890_v41  ;;  %3235 = vmatprep.subr.mxu0 %v3764_v53 }
 0x3f3   :  { %3202 = vmatpush3.msra.mxu1 %v1890_v41  ;;  %3236 = vmatpush3.msra.mxu0 %v2052_v60 }
 0x3f4   :  { %3203 = vmatprep.subr.mxu1 %v1889_v2  ;;  %3237 = vmatprep.subr.mxu0 %v3764_v53 }
 0x3f5   :  { %3204 = vmatpush3.msra.mxu1 %v1889_v2  ;;  %3238 = vmatpush3.msra.mxu0 %v2051_v61 }
 0x3f6   :  { %3205 = vmatprep.subr.mxu1 %v1888_v6  ;;  %3239 = vmatprep.subr.mxu0 %v3764_v53 }
 0x3f7   :  { %3206 = vmatpush3.msra.mxu1 %v1888_v6  ;;  %3240 = vmatpush3.msra.mxu0 %v2050_v63  ;;  %v1251_v6 = vadd.f32 %v2624_v25, %v4247_v58  ;;  %v2127_v25 = vld [vmem:[%s4499_s15] sm:$0xff] }
 0x3f8   :  { %3207 = vmatprep.subr.mxu1 %v1887_v42  ;;  %3241 = vmatprep.subr.mxu0 %v3764_v53 }
 0x3f9   :  { %3208 = vmatpush3.msra.mxu1 %v1887_v42  ;;  %3242 = vmatpush3.msra.mxu0 %v2049_v0 }
 0x3fa   :  { %3209 = vmatprep.subr.mxu1 %v1886_v1  ;;  %3243 = vmatprep.subr.mxu0 %v3764_v53 }
 0x3fb   :  { %3210 = vmatpush3.msra.mxu1 %v1886_v1  ;;  %3244 = vmatpush3.msra.mxu0 %v2048_v3 }
 0x3fc   :  { %3211 = vmatprep.subr.mxu1 %v1885_v10  ;;  %3245 = vmatprep.subr.mxu0 %v3764_v53 }
 0x3fd   :  { %3212 = vmatpush3.msra.mxu1 %v1885_v10  ;;  %3246 = vmatpush3.msra.mxu0 %v2047_v4 }
 0x3fe   :  { %3213 = vmatprep.subr.mxu1 %v1884_v43  ;;  %3247 = vmatprep.subr.mxu0 %v3764_v53 }
 0x3ff   :  { %3214 = vmatpush3.msra.mxu1 %v1884_v43  ;;  %3248 = vmatpush3.msra.mxu0 %v2046_v5 }
 0x400   :  { %3215 = vmatprep.subr.mxu1 %v1883_v44  ;;  %3249 = vmatprep.subr.mxu0 %v3764_v53 }
 0x401   :  { %3216 = vmatpush3.msra.mxu1 %v1883_v44  ;;  %3250 = vmatpush3.msra.mxu0 %v2045_v7 }
 0x402   :  { %3217 = vmatprep.subr.mxu1 %v1882_v45  ;;  %3251 = vmatprep.subr.mxu0 %v3764_v53 }
 0x403   :  { %3218 = vmatpush3.msra.mxu1 %v1882_v45  ;;  %3252 = vmatpush3.msra.mxu0 %v2044_v8 }
 0x404   :  { %3219 = vmatprep.subr.mxu1 %v1881_v48  ;;  %3253 = vmatprep.subr.mxu0 %v3764_v53 }
 0x405   :  { %3220 = vmatpush3.msra.mxu1 %v1881_v48  ;;  %3254 = vmatpush3.msra.mxu0 %v2043_v9 }
 0x406   :  { %3221 = vmatprep.subr.mxu1 %v1880_v49  ;;  %3255 = vmatprep.subr.mxu0 %v3764_v53 }
 0x407   :  { %3222 = vmatpush3.msra.mxu1 %v1880_v49  ;;  %3256 = vmatpush3.msra.mxu0 %v2042_v11 }
 0x408   :  { %3224 = vmatmul.mubr.f32.vlgmr.msra.gmra.mxu1 %v4249_v47  ;;  %3264 = vmatprep.subr.mxu1 %v3764_v53 }
 0x409   :  { %3226 = vmatprep.mubr.f32.mxu1 %v4257_v23  ;;  %3265 = vmatpush3.msra.mxu1 %v2055_v55 }
 0x40a   :  { %3266 = vmatprep.subr.mxu1 %v3764_v53  ;;  %3257 = vmatprep.subr.mxu0 %v3764_v53 }
 0x40b   :  { %3267 = vmatpush3.msra.mxu1 %v2054_v59  ;;  %3258 = vmatpush3.msra.mxu0 %v2041_v12 }
 0x40c   :  { %3227 = vmatmul.mubr.f32.gmra.mxu1 %v4253_v22  ;;  %3268 = vmatprep.subr.mxu1 %v3764_v53 }
 0x40d   :  { %3269 = vmatpush3.msra.mxu1 %v2053_v51  ;;  %3296 = vmatprep.mubr.msk.f32.mxu1 %vm3765_vm14, %v3764_v53 }
 0x40e   :  { %3270 = vmatprep.subr.mxu1 %v3764_v53  ;;  %3259 = vmatprep.subr.mxu0 %v3764_v53 }
 0x40f   :  { %3271 = vmatpush3.msra.mxu1 %v2052_v60  ;;  %3260 = vmatpush3.msra.mxu0 %v2040_v13 }
 0x410   :  { %3272 = vmatprep.subr.mxu1 %v3764_v53  ;;  %3261 = vmatprep.mubr.msk.f32.mxu0 %vm3765_vm14, %v3764_v53 }
 0x411   :  { %3273 = vmatpush3.msra.mxu1 %v2051_v61  ;;  %3299 = vmatprep.subr.mxu0 %v3764_v53 }
 0x412   :  { %3274 = vmatprep.subr.mxu1 %v3764_v53 }
 0x413   :  { %3275 = vmatpush3.msra.mxu1 %v2050_v63 }
 0x414   :  { %3276 = vmatprep.subr.mxu1 %v3764_v53 }
 0x415   :  { %3277 = vmatpush3.msra.mxu1 %v2049_v0 }
 0x416   :  { %3278 = vmatprep.subr.mxu1 %v3764_v53 }
 0x417   :  { %3279 = vmatpush3.msra.mxu1 %v2048_v3 }
 0x418   :  { %3280 = vmatprep.subr.mxu1 %v3764_v53 }
 0x419   :  { %3281 = vmatpush3.msra.mxu1 %v2047_v4 }
 0x41a   :  { %3282 = vmatprep.subr.mxu1 %v3764_v53 }
 0x41b   :  { %3283 = vmatpush3.msra.mxu1 %v2046_v5 }
 0x41c   :  { %3284 = vmatprep.subr.mxu1 %v3764_v53 }
 0x41d   :  { %3285 = vmatpush3.msra.mxu1 %v2045_v7 }
 0x41e   :  { %3286 = vmatprep.subr.mxu1 %v3764_v53 }
 0x41f   :  { %3287 = vmatpush3.msra.mxu1 %v2044_v8 }
 0x420   :  { %3288 = vmatprep.subr.mxu1 %v3764_v53 }
 0x421   :  { %3289 = vmatpush3.msra.mxu1 %v2043_v9 }
 0x422   :  { %3290 = vmatprep.subr.mxu1 %v3764_v53 }
 0x423   :  { %3291 = vmatpush3.msra.mxu1 %v2042_v11 }
 0x424   :  { %3292 = vmatprep.subr.mxu1 %v3764_v53 }
 0x425   :  { %3293 = vmatpush3.msra.mxu1 %v2041_v12 }
 0x426   :  { %3294 = vmatprep.subr.mxu1 %v3764_v53 }
 0x427   :  { %3295 = vmatpush3.msra.mxu1 %v2040_v13 }
 0x428   :  { %3344 = vmatprep.subr.mxu1 %v3764_v53 }
 0x4a7   :  { %v3149_v39 = vpop.f32.mrf.mxu1  ;;  %v3187_v14 = vpop.f32.mrf.mxu0 }
 0x4a8   :  { %v1866_v19 = vadd.f32 %v3187_v14, %v3149_v39 }
 0x4a9   :  { %v1775_v15 = vpop.f32.mrf.mxu1  ;;  %v1860_v47 = vpop.f32.mrf.mxu0 }
 0x4aa   :  { %v1861_v27 = vadd.f32 %v1860_v47, %v1775_v15 }
 0x4ac   :  { %v3152_v16 = vpop.f32.mrf.mxu1  ;;  %v3190_v17 = vpop.f32.mrf.mxu0 }
 0x4ad   :  { %v1876_v28 = vadd.f32 %v3190_v17, %v3152_v16 }
 0x4ae   :  { %v1785_v18 = vpop.f32.mrf.mxu1  ;;  %v1870_v22 = vpop.f32.mrf.mxu0 }
 0x4af   :  { %v1871_v24 = vadd.f32 %v1870_v22, %v1785_v18 }
 0x4c8   :  { %v3225_v20 = vpop.f32.mrf.mxu1 }
 0x4c9   :  { %v1982_v38 = vadd.f32 %v3225_v20, %v1866_v19 }
 0x4ca   :  { %v1962_v46 = vpop.f32.mrf.mxu1 }
 0x4cb   :  { %v1993_v29 = vadd.f32 %v2650_v21, %v1982_v38  ;;  %v1981_v23 = vadd.f32 %v1962_v46, %v1861_v27 }
 0x4cc   :  { %v3228_v31 = vpop.f32.mrf.mxu1 }
 0x4cd   :  { %v1997_v32 = vmax.f32 %v1993_v29, 0.0  ;;  %v1992_v33 = vadd.f32 %v2650_v21, %v1981_v23  ;;  %v1984_v57 = vadd.f32 %v3228_v31, %v1876_v28 }
 0x4ce   :  { %v1972_v26 = vpop.f32.mrf.mxu1 }
 0x4cf   :  { %v2001_v34 = vadd.f32 %v1997_v32, %v1246_v30  ;;  %v1996_v56 = vmax.f32 %v1992_v33, 0.0  ;;  %v1995_v35 = vadd.f32 %v2650_v21, %v1984_v57  ;;  %v1983_v62 = vadd.f32 %v1972_v26, %v1871_v24 }
 0x4d1   :  { %v2000_v40 = vadd.f32 %v1996_v56, %v1241_v37  ;;  %v1999_v41 = vmax.f32 %v1995_v35, 0.0  ;;  %v1994_v2 = vadd.f32 %v2650_v21, %v1983_v62  ;;  %v2005_v50 = vmax.f32 %v2001_v34, 0.0 }
 0x4d3   :  { %v2004_v42 = vmax.f32 %v2000_v40, 0.0  ;;  %v2003_v1 = vadd.f32 %v1999_v41, %v1256_v36  ;;  %v1998_v10 = vmax.f32 %v1994_v2, 0.0  ;;  %v2398_v36 = vld [vmem:[%s4502_s18 + $0x78] sm:$0xff]  ;;  %v2397_v40 = vld [vmem:[%s4502_s18 + $0x70] sm:$0xff]  ;;  %v2396_v41 = vld [vmem:[%s4502_s18 + $0x68] sm:$0xff] }
 0x4d4   :  { %v2395_v2 = vld [vmem:[%s4502_s18 + $0x60] sm:$0xff] }
 0x4d5   :  { %v2008_v43 = vadd.f32 %v2005_v50, %v2004_v42  ;;  %v2016_v44 = vmax.f32 %v2004_v42, %v2005_v50  ;;  %v2002_v45 = vadd.f32 %v1998_v10, %v1251_v6  ;;  %v2007_v49 = vmax.f32 %v2003_v1, 0.0 }
 0x4d7   :  { %v2009_v52 = vrot.slane %v2008_v43, 4  ;;  %v2017_v48 = vrot.slane %v2016_v44, 4  ;;  %v2006_v55 = vmax.f32 %v2002_v45, 0.0  ;;  %v2392_v45 = vld [vmem:[%s4502_s18 + $0x48] sm:$0xff] }
 0x4d9   :  { %v2010_v59 = vadd.f32 %v2009_v52, %v2008_v43  ;;  %v2018_v51 = vmax.f32 %v2016_v44, %v2017_v48  ;;  %v2023_v60 = vadd.f32 %v2007_v49, %v2006_v55  ;;  %v2031_v54 = vmax.f32 %v2006_v55, %v2007_v49  ;;  %v2394_v43 = vld [vmem:[%s4502_s18 + $0x58] sm:$0xff]  ;;  %v2393_v44 = vld [vmem:[%s4502_s18 + $0x50] sm:$0xff]  ;;  %v2391_v52 = vld [vmem:[%s4502_s18 + $0x40] sm:$0xff] }
 0x4da   :  { %v2390_v48 = vld [vmem:[%s4502_s18 + $0x38] sm:$0xff]  ;;  %v2389_v49 = vld [vmem:[%s4502_s18 + $0x30] sm:$0xff]  ;;  %v2388_v55 = vld [vmem:[%s4502_s18 + $0x28] sm:$0xff] }
 0x4db   :  { %v2011_v61 = vrot.slane %v2010_v59, 2  ;;  %v2019_v63 = vrot.slane %v2018_v51, 2  ;;  %v2024_v0 = vrot.slane %v2023_v60, 4  ;;  %v2032_v3 = vrot.slane %v2031_v54, 4 }
 0x4dd   :  { %v2012_v58 = vadd.f32 %v2011_v61, %v2010_v59  ;;  %v2020_v4 = vmax.f32 %v2018_v51, %v2019_v63  ;;  %v2025_v5 = vadd.f32 %v2024_v0, %v2023_v60  ;;  %v2033_v7 = vmax.f32 %v2031_v54, %v2032_v3  ;;  %v2387_v59 = vld [vmem:[%s4502_s18 + $0x20] sm:$0xff]  ;;  %v2386_v51 = vld [vmem:[%s4502_s18 + $0x18] sm:$0xff]  ;;  %v2385_v60 = vld [vmem:[%s4502_s18 + $0x10] sm:$0xff] }
 0x4de   :  { %v2384_v54 = vld [vmem:[%s4502_s18 + $0x8] sm:$0xff]  ;;  %v2383_v61 = vld [vmem:[%s4502_s18] sm:$0xff]  ;;  %v2490_v3 = vld [vmem:[#allocation25 + $0x68] sm:$0xff] }
 0x4df   :  { %v2026_v8 = vrot.slane %v2025_v5, 2  ;;  %v2034_v9 = vrot.slane %v2033_v7, 2  ;;  %v2013_v11 = vrot.slane %v2012_v58, 1  ;;  %v2021_v39 = vrot.slane %v2020_v4, 1  ;;  %v2492_v63 = vld [vmem:[#allocation25 + $0x78] sm:$0xff]  ;;  %v2491_v0 = vld [vmem:[#allocation25 + $0x70] sm:$0xff] }
 0x4e1   :  { %v2027_v12 = vadd.f32 %v2026_v8, %v2025_v5  ;;  %v2035_v13 = vmax.f32 %v2033_v7, %v2034_v9  ;;  %v2014_v15 = vadd.f32 %v2013_v11, %v2012_v58  ;;  %v2022_v16 = vmax.f32 %v2020_v4, %v2021_v39  ;;  %v2489_v58 = vld [vmem:[#allocation25 + $0x60] sm:$0xff]  ;;  %v2488_v4 = vld [vmem:[#allocation25 + $0x58] sm:$0xff]  ;;  %v2487_v5 = vld [vmem:[#allocation25 + $0x50] sm:$0xff] }
 0x4e2   :  { %v2486_v7 = vld [vmem:[#allocation25 + $0x48] sm:$0xff]  ;;  %v2485_v8 = vld [vmem:[#allocation25 + $0x40] sm:$0xff]  ;;  %v2484_v9 = vld [vmem:[#allocation25 + $0x38] sm:$0xff] }
 0x4e3   :  { %v2036_v14 = vrot.slane %v2035_v13, 1  ;;  %v2028_v47 = vrot.slane %v2027_v12, 1  ;;  %v2015_v20 = vmul.f32 0.0625, %v2014_v15  ;;  %v2483_v11 = vld [vmem:[#allocation25 + $0x30] sm:$0xff]  ;;  %v2480_v39 = vld [vmem:[#allocation25 + $0x18] sm:$0xff] }
 0x4e5   :  { %v2037_v17 = vmax.f32 %v2035_v13, %v2036_v14  ;;  %v2029_v18 = vadd.f32 %v2028_v47, %v2027_v12  ;;  %v2482_v12 = vld [vmem:[#allocation25 + $0x28] sm:$0xff]  ;;  %v2481_v13 = vld [vmem:[#allocation25 + $0x20] sm:$0xff] }
 0x4e7   :  { %v2039_v19 = vsel %vm421_vm13, %v2022_v16, %v2037_v17  ;;  %v2030_v21 = vmul.f32 0.0625, %v2029_v18  ;;  %v2653_v17 = vld [vmem:[#allocation20] ss:$0 sm:$0xff] }
 0x4e8   :  { %3297 = vmatmul.mubr.f32.vlgmr.msra.gmra.mxu1 %v2039_v19  ;;  %v2654_v19 = vld [vmem:[#allocation22] ss:$0 sm:$0xff] }
 0x4e9   :  { %v2038_v27 = vsel %vm421_vm13, %v2015_v20, %v2030_v21  ;;  %3376 = vmatprep.mubr.msk.f32.mxu1 %vm3765_vm14, %v3764_v53  ;;  %3345 = vmatpush3.msra.mxu1 %v2492_v63 }
 0x4ea   :  { %3262 = vmatmul.mubr.f32.vlgmr.msra.gmra.mxu0 %v2038_v27  ;;  %3346 = vmatprep.subr.mxu1 %v3764_v53 }
 0x4eb   :  { %3300 = vmatpush3.msra.mxu0 %v2127_v25  ;;  %3301 = vmatprep.mubr.msk.f32.mxu0 %vm3765_vm14, %v3764_v53 }
 0x4ec   :  { %3304 = vmatprep.subr.mxu0 %v3764_v53  ;;  %3347 = vmatpush3.msra.mxu1 %v2491_v0 }
 0x4ed   :  { %3348 = vmatprep.subr.mxu1 %v3764_v53 }
 0x4ee   :  { %3349 = vmatpush3.msra.mxu1 %v2490_v3 }
 0x4ef   :  { %3350 = vmatprep.subr.mxu1 %v3764_v53 }
 0x4f0   :  { %3351 = vmatpush3.msra.mxu1 %v2489_v58 }
 0x4f1   :  { %3352 = vmatprep.subr.mxu1 %v3764_v53 }
 0x4f2   :  { %3353 = vmatpush3.msra.mxu1 %v2488_v4 }
 0x4f3   :  { %3354 = vmatprep.subr.mxu1 %v3764_v53 }
 0x4f4   :  { %3355 = vmatpush3.msra.mxu1 %v2487_v5 }
 0x4f5   :  { %3356 = vmatprep.subr.mxu1 %v3764_v53 }
 0x4f6   :  { %3357 = vmatpush3.msra.mxu1 %v2486_v7 }
 0x4f7   :  { %3358 = vmatprep.subr.mxu1 %v3764_v53 }
 0x4f8   :  { %3359 = vmatpush3.msra.mxu1 %v2485_v8 }
 0x4f9   :  { %3360 = vmatprep.subr.mxu1 %v3764_v53 }
 0x4fa   :  { %3361 = vmatpush3.msra.mxu1 %v2484_v9 }
 0x4fb   :  { %3362 = vmatprep.subr.mxu1 %v3764_v53 }
 0x4fc   :  { %3363 = vmatpush3.msra.mxu1 %v2483_v11 }
 0x4fd   :  { %3364 = vmatprep.subr.mxu1 %v3764_v53 }
 0x4fe   :  { %3365 = vmatpush3.msra.mxu1 %v2482_v12 }
 0x4ff   :  { %3366 = vmatprep.subr.mxu1 %v3764_v53 }
 0x500   :  { %3367 = vmatpush3.msra.mxu1 %v2481_v13 }
 0x501   :  { %3368 = vmatprep.subr.mxu1 %v3764_v53 }
 0x502   :  { %3369 = vmatpush3.msra.mxu1 %v2480_v39 }
 0x503   :  { %3370 = vmatprep.subr.mxu1 %v3764_v53 }
 0x5a8   :  { %v2194_v38 = vpop.f32.mrf.mxu1 }
 0x5a9   :  { %v2198_v22 = vmax.f32 %v2194_v38, 0.0  ;;  %v2477_v38 = vld [vmem:[#allocation25] sm:$0xff] }
 0x5aa   :  { %v2122_v46 = vpop.f32.mrf.mxu0  ;;  %v3298_v28 = vpop.f32.mrf.mxu1 }
 0x5ab   :  { %3302 = vmatmul.mubr.msk.f32.vlgmr.msra.gmra.mxu0 %vm2199_vm0, %v2198_v22  ;;  %v2126_v23 = vmax.f32 %v2122_v46, 0.0  ;;  %v2655_v22 = vld [vmem:[#allocation23] ss:$0 sm:$0xff] }
 0x5ac   :  { %3305 = vmatpush3.msra.mxu0 %v2127_v25  ;;  %v3263_v29 = vpop.f32.mrf.mxu0  ;;  %3306 = vmatprep.mubr.msk.f32.mxu0 %vm3765_vm14, %v3764_v53  ;;  %v2479_v25 = vld [vmem:[#allocation25 + $0x10] sm:$0xff] }
 0x5ad   :  { %3309 = vmatprep.subr.mxu0 %v3764_v53  ;;  %3371 = vmatpush3.msra.mxu1 %v2479_v25 }
 0x5ae   :  { %3372 = vmatprep.subr.mxu1 %v3764_v53 }
 0x5af   :  { %3307 = vmatmul.mubr.msk.f32.vlgmr.msra.gmra.mxu0 %vm2199_vm0, %v2126_v23 }
 0x5b0   :  { %3341 = vmatprep.mubr.msk.f32.mxu0 %vm3765_vm14, %v3764_v53  ;;  %3310 = vmatpush3.msra.mxu0 %v2398_v36 }
 0x5b1   :  { %3311 = vmatprep.subr.mxu0 %v3764_v53 }
 0x5b2   :  { %3312 = vmatpush3.msra.mxu0 %v2397_v40 }
 0x5b3   :  { %3313 = vmatprep.subr.mxu0 %v3764_v53 }
 0x5b4   :  { %3314 = vmatpush3.msra.mxu0 %v2396_v41 }
 0x5b5   :  { %3315 = vmatprep.subr.mxu0 %v3764_v53 }
 0x5b6   :  { %3316 = vmatpush3.msra.mxu0 %v2395_v2 }
 0x5b7   :  { %3317 = vmatprep.subr.mxu0 %v3764_v53 }
 0x5b8   :  { %3318 = vmatpush3.msra.mxu0 %v2394_v43 }
 0x5b9   :  { %3319 = vmatprep.subr.mxu0 %v3764_v53 }
 0x5ba   :  { %3320 = vmatpush3.msra.mxu0 %v2393_v44 }
 0x5bb   :  { %3321 = vmatprep.subr.mxu0 %v3764_v53 }
 0x5bc   :  { %3322 = vmatpush3.msra.mxu0 %v2392_v45 }
 0x5bd   :  { %3323 = vmatprep.subr.mxu0 %v3764_v53 }
 0x5be   :  { %3324 = vmatpush3.msra.mxu0 %v2391_v52 }
 0x5bf   :  { %3325 = vmatprep.subr.mxu0 %v3764_v53 }
 0x5c0   :  { %3326 = vmatpush3.msra.mxu0 %v2390_v48 }
 0x5c1   :  { %3327 = vmatprep.subr.mxu0 %v3764_v53 }
 0x5c2   :  { %3328 = vmatpush3.msra.mxu0 %v2389_v49 }
 0x5c3   :  { %3329 = vmatprep.subr.mxu0 %v3764_v53 }
 0x5c4   :  { %3330 = vmatpush3.msra.mxu0 %v2388_v55 }
 0x5c5   :  { %3331 = vmatprep.subr.mxu0 %v3764_v53 }
 0x5c6   :  { %3332 = vmatpush3.msra.mxu0 %v2387_v59 }
 0x5c7   :  { %3333 = vmatprep.subr.mxu0 %v3764_v53 }
 0x5c8   :  { %3334 = vmatpush3.msra.mxu0 %v2386_v51 }
 0x5c9   :  { %3335 = vmatprep.subr.mxu0 %v3764_v53 }
 0x5ca   :  { %3336 = vmatpush3.msra.mxu0 %v2385_v60 }
 0x5cb   :  { %3337 = vmatprep.subr.mxu0 %v3764_v53 }
 0x5cc   :  { %3338 = vmatpush3.msra.mxu0 %v2384_v54 }
 0x5cd   :  { %3339 = vmatprep.subr.mxu0 %v3764_v53 }
 0x5ce   :  { %3340 = vmatpush3.msra.mxu0 %v2383_v61 }
 0x66b   :  { %v2269_v30 = vpop.f32.mrf.mxu0 }
 0x66d   :  { %v3303_v31 = vpop.f32.mrf.mxu0 }
 0x66f   :  { %v2342_v24 = vpop.f32.mrf.mxu0 }
 0x670   :  { %v2343_v32 = vadd.f32 %v2342_v24, %v2269_v30  ;;  %v2656_v30 = vld [vmem:[%s4505_s21] ss:$0 sm:$0xff] }
 0x671   :  { %v3308_v33 = vpop.f32.mrf.mxu0 }
 0x672   :  { %v2346_v57 = vsub.f32 0.0, %v2343_v32 }
 0x674   :  { %v2347_v37 = vmul.f32 1.442695, %v2346_v57 }
 0x676   :  { %3402 = vpow2.f32 %v2347_v37 }
 0x683   :  { %v3403_v26 = vpop.eup %3402 }
 0x684   :  { %v2349_v34 = vadd.f32 1.0, %v3403_v26 }
 0x686   :  { %3404 = vrcp.f32 %v2349_v34 }
 0x693   :  { %v3405_v56 = vpop.eup %3404 }
 0x694   :  { %v2352_v35 = vmul.f32 %v3405_v56, %v2038_v27  ;;  %v2478_v27 = vld [vmem:[#allocation25 + $0x8] sm:$0xff] }
 0x695   :  { %3373 = vmatpush3.msra.mxu1 %v2478_v27 }
 0x696   :  { %v2353_v62 = vsel %vm376_vm15, %v2352_v35, 0.0  ;;  %3374 = vmatprep.subr.mxu1 %v3764_v53 }
 0x697   :  { %2354 = vadd.xlane.f32.xlu0 %v2353_v62  ;;  %3375 = vmatpush3.msra.mxu1 %v2477_v38 }
 0x720   :  { %v2355_v6 = vpop.xlane.xlu0 %2354 }
 0x721   :  { %v2357_v50 = vmul.f32 0.0078125, %v2355_v6 }
 0x723   :  { %v4410_v42 = vsub.f32 %v2352_v35, %v2357_v50 }
 0x725   :  { %v2359_v1 = vmul.f32 %v4410_v42, %v4410_v42 }
 0x727   :  { %v2360_v10 = vsel %vm376_vm15, %v2359_v1, 0.0 }
 0x728   :  { %2361 = vadd.xlane.f32.xlu1 %v2360_v10 }
 0x7b1   :  { %v2362_v14 = vpop.xlane.xlu1 %2361 }
 0x7b2   :  { %v2363_v15 = vmul.f32 0.0078125, %v2362_v14 }
 0x7b4   :  { %v2364_v47 = vadd.f32 1e-05, %v2363_v15 }
 0x7b6   :  { %3406 = vrsqrt.f32 %v2364_v47 }
 0x7c3   :  { %v3407_v16 = vpop.eup %3406 }
 0x7c4   :  { %v2366_v18 = vmul.f32 %v3407_v16, %v4410_v42 }
 0x7c6   :  { %v2374_v20 = vmul.f32 %v2653_v17, %v2366_v18 }
 0x7c8   :  { %v2382_v21 = vadd.f32 %v2654_v19, %v2374_v20 }
 0x7ca   :  { %3342 = vmatmul.mubr.f32.vlgmr.msra.gmra.mxu0 %v2382_v21 }
 0x88a   :  { %v2472_v46 = vpop.f32.mrf.mxu0 }
 0x88b   :  { %v2473_v28 = vadd.f32 %v2655_v22, %v2472_v46 }
 0x88c   :  { %v3343_v29 = vpop.f32.mrf.mxu0 }
 0x88d   :  { %v2476_v23 = vmax.f32 %v2473_v28, 0.0 }
 0x88f   :  { %3377 = vmatmul.mubr.f32.vlgmr.msra.gmra.mxu1 %v2476_v23 }
 0x94f   :  { %v2566_v31 = vpop.f32.mrf.mxu1 }
 0x950   :  { %v2567_v24 = vadd.f32 %v2656_v30, %v2566_v31 }
 0x951   :  { %v3378_v32 = vpop.f32.mrf.mxu1 }
 0x952   :  { %2570 = vst [vmem:[#allocation26] sm:$0x3] %v2567_v24 }
 0x953   :  { %3719 = shalt.err (!%p3716_p9)
}
 0x954   :  { %s4523_s30 = sld [smem:[#allocation43_spill]] }
 0x95a   :  { %2580 = dma.vmem_to_hbm [thread:$0]  %s2578_s22, 32, %s4523_s30, [#allocation4]  }
 0x95b   :  { %3744 = dma.done.wait [#allocation4], 32  }
 0x95c   :  { %3745 = vsyncadd [#allocation4], 4294967264 }
 0x95d   :  { %2584 = vsyncpa [#allocation3], 1 }
 0x95e   :  { %2585 = vsyncpa [#allocation6], 1 }
 0x95f   :  { %2586 = vsyncpa [#allocation9], 1 }
 0x960   :  { %2587 = vsyncpa [#allocation12], 1 }
 0x961   :  { %2588 = vsyncpa [#allocation15], 1 }
 0x962   :  { %2589 = vsyncpa [#allocation18], 1 }
 0x963   :  { %2590 = vsyncpa [#allocation21], 1 }
 0x964   :  { %2591 = vsyncpa [#allocation24], 1 }
 0x965   :  { %2592 = vsyncpa [#allocation4], 1 }

</bundles_post_ra>
